<compile_context>
chip_gen: v7x
topology: tpu7x:2x2x1
jax: 0.10.0
libtpu: 0.0.40
codegen_flags: <defaults>
</compile_context>

<pallas_src>
import functools

import jax
import jax.numpy as jnp
from jax.experimental import pallas as pl
from jax.experimental.pallas import tpu as pltpu


def _bencoder_kernel(x_ref, w_ref, b_ref, out_ref, seq_ref, *,
                     n_layers, hidden, seq_len, d_pad):
    """Fused multi-layer LSTM over the whole sequence.

    x_ref   : (T, B, d_pad)             input sequence, feature dim zero-padded
    w_ref   : (L, d_pad + H, 4H)        stacked [W_ih^T ; W_hh^T], gates [i,f,o,g]
    b_ref   : (L, 1, 4H)                combined bias b_ih + b_hh, gates [i,f,o,g]
    out_ref : (B, H)                    final hidden state of the LAST layer
    seq_ref : (T, B, d_pad)  VMEM scratch holding the previous layer's outputs
    """
    H = hidden
    T = seq_len
    B = out_ref.shape[0]

    h_last = None
    for layer in range(n_layers):            # static python loop over layers
        w_l = w_ref[layer]                    # (d_pad + H, 4H), hoisted
        b_l = b_ref[layer]                    # (1, 4H), hoisted
        in_ref = x_ref if layer == 0 else seq_ref
        write_seq = layer < n_layers - 1      # last layer only needs h_T

        def step(t, carry, in_ref=in_ref, w_l=w_l, b_l=b_l, write_seq=write_seq):
            h_prev, c_prev = carry
            x_t = in_ref[t]                                        # (B, d_pad)
            xin = jnp.concatenate([x_t, h_prev], axis=-1)          # (B, d_pad+H)
            gates = jnp.dot(xin, w_l,
                            preferred_element_type=jnp.float32) + b_l   # (B, 4H)
            sig = jax.nn.sigmoid(gates[:, :3 * H])                 # [i | f | o]
            g_g = jnp.tanh(gates[:, 3 * H:])                       # g
            i_g = sig[:, 0 * H:1 * H]
            f_g = sig[:, 1 * H:2 * H]
            o_g = sig[:, 2 * H:3 * H]
            c_new = f_g * c_prev + i_g * g_g
            h_new = o_g * jnp.tanh(c_new)
            if write_seq:
                if d_pad > H:
                    seq_ref[t] = jnp.concatenate(
                        [h_new, jnp.zeros((B, d_pad - H), jnp.float32)], axis=-1)
                else:
                    seq_ref[t] = h_new
            return (h_new, c_new)

        h0 = jnp.zeros((B, H), jnp.float32)
        c0 = jnp.zeros((B, H), jnp.float32)
        h_last, _ = jax.lax.fori_loop(0, T, step, (h0, c0), unroll=True)

    out_ref[...] = h_last.astype(out_ref.dtype)


def _prep_params(params, dim_hidden):
    """Reorder gates to [i,f,o,g], transpose, zero-pad and stack per layer."""
    H = dim_hidden
    d_ins = [w_ih.shape[1] for (w_ih, _, _, _) in params]
    d_pad = max(d_ins + [H])
    perm = jnp.concatenate([jnp.arange(0, H),            # i
                            jnp.arange(H, 2 * H),        # f
                            jnp.arange(3 * H, 4 * H),    # o
                            jnp.arange(2 * H, 3 * H)])   # g
    ws, bs = [], []
    for (w_ih, w_hh, b_ih, b_hh) in params:
        d_in = w_ih.shape[1]
        w_ih_t = jnp.transpose(w_ih[perm]).astype(jnp.float32)   # (d_in, 4H)
        w_hh_t = jnp.transpose(w_hh[perm]).astype(jnp.float32)   # (H, 4H)
        bias = (b_ih + b_hh)[perm].reshape(1, 4 * H).astype(jnp.float32)
        if d_in < d_pad:
            w_ih_t = jnp.concatenate(
                [w_ih_t, jnp.zeros((d_pad - d_in, 4 * H), jnp.float32)], axis=0)
        ws.append(jnp.concatenate([w_ih_t, w_hh_t], axis=0))      # (d_pad+H, 4H)
        bs.append(bias)
    return jnp.stack(ws), jnp.stack(bs), d_pad


def bencoder_forward(x, params, dim_hidden):
    """BEncoder.forward with ib=False.

    x      : (B, T, n_in) batch_first, matching the PyTorch module.
    returns pre : (B, dim_hidden) -- final hidden state of the last LSTM layer.
    """
    B, T, n_in = x.shape
    H = dim_hidden
    n_layers = len(params)

    w_stacked, b_stacked, d_pad = _prep_params(params, H)

    # Pad batch to a multiple of 8 sublanes; go time-major for the kernel.
    B_pad = max(8, ((B + 7) // 8) * 8)
    x_seq = jnp.transpose(x, (1, 0, 2)).astype(jnp.float32)       # (T, B, n_in)
    x_pad = jnp.zeros((T, B_pad, d_pad), jnp.float32)
    x_pad = x_pad.at[:, :B, :n_in].set(x_seq)

    kernel = functools.partial(_bencoder_kernel, n_layers=n_layers,
                               hidden=H, seq_len=T, d_pad=d_pad)

    out = pl.pallas_call(
        kernel,
        out_shape=jax.ShapeDtypeStruct((B_pad, H), jnp.float32),
        in_specs=[pl.BlockSpec(memory_space=pltpu.MemorySpace.VMEM)] * 3,
        out_specs=pl.BlockSpec(memory_space=pltpu.MemorySpace.VMEM),
        scratch_shapes=[pltpu.VMEM((T, B_pad, d_pad), jnp.float32)],
    )(x_pad, w_stacked, b_stacked)

    return out[:B]
    # TODO(synk): ib=True branch (NormConv2d mu/std + reparametrize) not
    # implemented; NormConv2d is an external module not defined in the spec.


def make_bencoder_params(key, n_in, n_layers, dim_hidden):
    """Deterministic parameter init mimicking PyTorch LSTM default
    (uniform(-1/sqrt(H), 1/sqrt(H))). PyTorch gate order [i, f, g, o]."""
    params = []
    bound = 1.0 / jnp.sqrt(jnp.float32(dim_hidden))
    for layer in range(n_layers):
        d_in = n_in if layer == 0 else dim_hidden
        key, k1, k2, k3, k4 = jax.random.split(key, 5)
        w_ih = jax.random.uniform(k1, (4 * dim_hidden, d_in),
                                  jnp.float32, -bound, bound)
        w_hh = jax.random.uniform(k2, (4 * dim_hidden, dim_hidden),
                                  jnp.float32, -bound, bound)
        b_ih = jax.random.uniform(k3, (4 * dim_hidden,),
                                  jnp.float32, -bound, bound)
        b_hh = jax.random.uniform(k4, (4 * dim_hidden,),
                                  jnp.float32, -bound, bound)
        params.append((w_ih, w_hh, b_ih, b_hh))
    return params


def _reference_forward(x, params, dim_hidden):
    """Pure-JAX reference (lax.scan, PyTorch gate order) for correctness."""
    x_seq = jnp.transpose(x, (1, 0, 2)).astype(jnp.float32)
    H = dim_hidden
    h_seq = x_seq
    for (w_ih, w_hh, b_ih, b_hh) in params:
        B = h_seq.shape[1]
        h0 = jnp.zeros((B, H), jnp.float32)
        c0 = jnp.zeros((B, H), jnp.float32)

        def step(carry, x_t, w_ih=w_ih, w_hh=w_hh, b_ih=b_ih, b_hh=b_hh):
            h, c = carry
            gates = x_t @ w_ih.T + h @ w_hh.T + b_ih + b_hh
            i = jax.nn.sigmoid(gates[:, 0 * H:1 * H])
            f = jax.nn.sigmoid(gates[:, 1 * H:2 * H])
            g = jnp.tanh(gates[:, 2 * H:3 * H])
            o = jax.nn.sigmoid(gates[:, 3 * H:4 * H])
            c_new = f * c + i * g
            h_new = o * jnp.tanh(c_new)
            return (h_new, c_new), h_new

        (_, _), h_seq = jax.lax.scan(step, (h0, c0), h_seq)
    return h_seq[-1]


if __name__ == "__main__":
    # Shapes consistent with BEncoder(n_in=4, n_layers=2, dim_hidden=32,
    # use_linear=False, dim_linear=0, ib=False)
    B, T, N_IN, N_LAYERS, DIM_HIDDEN = 2, 8, 4, 2, 32

    key = jax.random.PRNGKey(0)
    key_x, key_p = jax.random.split(key)
    x = jax.random.normal(key_x, (B, T, N_IN), jnp.float32)
    params = make_bencoder_params(key_p, N_IN, N_LAYERS, DIM_HIDDEN)

    pre = bencoder_forward(x, params, DIM_HIDDEN)
    pre = jax.block_until_ready(pre)

    ref = jax.block_until_ready(_reference_forward(x, params, DIM_HIDDEN))
    assert pre.shape == (B, DIM_HIDDEN)
    assert jnp.allclose(pre, ref, atol=1e-4, rtol=1e-4), \
        f"max abs err {jnp.max(jnp.abs(pre - ref))}"

    print("KERNEL_OK")
</pallas_src>

<mosaic_0001>
module attributes {stable_mosaic.version = 11 : i64} {
  func.func @_bencoder_kernel(%arg0: memref<8x8x32xf32, #tpu.memory_space<vmem>>, %arg1: memref<2x64x128xf32, #tpu.memory_space<vmem>>, %arg2: memref<2x1x128xf32, #tpu.memory_space<vmem>>, %arg3: memref<8x32xf32, #tpu.memory_space<vmem>>, %arg4: memref<8x8x32xf32, #tpu.memory_space<vmem>>) attributes {dimension_semantics = [], scalar_prefetch = 0 : i64, scratch_operands = 1 : i64, tpu.core_type = #tpu.core_type<tc>} {
    %c0 = arith.constant 0 : index
    %c0_0 = arith.constant 0 : index
    %c0_1 = arith.constant 0 : index
    %0 = vector.load %arg1[%c0, %c0_0, %c0_1] : memref<2x64x128xf32, #tpu.memory_space<vmem>>, vector<1x64x128xf32>
    %1 = vector.shape_cast %0 : vector<1x64x128xf32> to vector<64x128xf32>
    %c0_2 = arith.constant 0 : index
    %c0_3 = arith.constant 0 : index
    %c0_4 = arith.constant 0 : index
    %2 = vector.load %arg2[%c0_2, %c0_3, %c0_4] : memref<2x1x128xf32, #tpu.memory_space<vmem>>, vector<1x1x128xf32>
    %3 = vector.shape_cast %2 : vector<1x1x128xf32> to vector<1x128xf32>
    %cst = arith.constant 0.000000e+00 : f32
    %4 = vector.broadcast %cst : f32 to vector<8x32xf32>
    %cst_5 = arith.constant 0.000000e+00 : f32
    %5 = vector.broadcast %cst_5 : f32 to vector<8x32xf32>
    %c0_i32 = arith.constant 0 : i32
    %6 = arith.index_cast %c0_i32 : i32 to index
    %c0_6 = arith.constant 0 : index
    %c0_7 = arith.constant 0 : index
    %7 = vector.load %arg0[%6, %c0_6, %c0_7] : memref<8x8x32xf32, #tpu.memory_space<vmem>>, vector<1x8x32xf32>
    %8 = vector.shape_cast %7 : vector<1x8x32xf32> to vector<8x32xf32>
    %9 = tpu.concatenate %8, %4 in 1 : vector<8x32xf32>, vector<8x32xf32> -> vector<8x64xf32>
    %cst_8 = arith.constant dense<0.000000e+00> : vector<8x128xf32>
    %10 = tpu.matmul %9, %1, %cst_8 {dimension_numbers = #tpu.dot_dimension_numbers<[1], [0], [0], [1], [0, 0, 1, 1], [], []>} : vector<8x64xf32>, vector<64x128xf32>, vector<8x128xf32> -> vector<8x128xf32>
    %11 = vector.broadcast %3 : vector<1x128xf32> to vector<8x128xf32>
    %12 = arith.addf %10, %11 : vector<8x128xf32>
    %13 = vector.extract_strided_slice %12 {offsets = [0, 0], sizes = [8, 96], strides = [1, 1]} : vector<8x128xf32> to vector<8x96xf32>
    %14 = arith.negf %13 : vector<8x96xf32>
    %15 = math.exp %14 : vector<8x96xf32>
    %cst_9 = arith.constant 1.000000e+00 : f32
    %16 = vector.broadcast %cst_9 : f32 to vector<8x96xf32>
    %17 = arith.addf %16, %15 : vector<8x96xf32>
    %18 = arith.divf %16, %17 : vector<8x96xf32>
    %19 = vector.extract_strided_slice %12 {offsets = [0, 96], sizes = [8, 32], strides = [1, 1]} : vector<8x128xf32> to vector<8x32xf32>
    %20 = math.tanh %19 : vector<8x32xf32>
    %21 = vector.extract_strided_slice %18 {offsets = [0, 0], sizes = [8, 32], strides = [1, 1]} : vector<8x96xf32> to vector<8x32xf32>
    %22 = vector.extract_strided_slice %18 {offsets = [0, 32], sizes = [8, 32], strides = [1, 1]} : vector<8x96xf32> to vector<8x32xf32>
    %23 = vector.extract_strided_slice %18 {offsets = [0, 64], sizes = [8, 32], strides = [1, 1]} : vector<8x96xf32> to vector<8x32xf32>
    %24 = arith.mulf %22, %5 : vector<8x32xf32>
    %25 = arith.mulf %21, %20 : vector<8x32xf32>
    %26 = arith.addf %24, %25 : vector<8x32xf32>
    %27 = math.tanh %26 : vector<8x32xf32>
    %28 = arith.mulf %23, %27 : vector<8x32xf32>
    %29 = arith.index_cast %c0_i32 : i32 to index
    %c0_10 = arith.constant 0 : index
    %c0_11 = arith.constant 0 : index
    %30 = vector.load %arg4[%29, %c0_10, %c0_11] : memref<8x8x32xf32, #tpu.memory_space<vmem>>, vector<1x8x32xf32>
    %31 = vector.shape_cast %30 : vector<1x8x32xf32> to vector<8x32xf32>
    %32 = vector.shape_cast %28 : vector<8x32xf32> to vector<1x8x32xf32>
    tpu.vector_store %arg4[%29, %c0_10, %c0_11], %32 {strides = array<i32>} : memref<8x8x32xf32, #tpu.memory_space<vmem>>, vector<1x8x32xf32>,
    %c1_i32 = arith.constant 1 : i32
    %33 = arith.index_cast %c1_i32 : i32 to index
    %c0_12 = arith.constant 0 : index
    %c0_13 = arith.constant 0 : index
    %34 = vector.load %arg0[%33, %c0_12, %c0_13] : memref<8x8x32xf32, #tpu.memory_space<vmem>>, vector<1x8x32xf32>
    %35 = vector.shape_cast %34 : vector<1x8x32xf32> to vector<8x32xf32>
    %36 = tpu.concatenate %35, %28 in 1 : vector<8x32xf32>, vector<8x32xf32> -> vector<8x64xf32>
    %cst_14 = arith.constant dense<0.000000e+00> : vector<8x128xf32>
    %37 = tpu.matmul %36, %1, %cst_14 {dimension_numbers = #tpu.dot_dimension_numbers<[1], [0], [0], [1], [0, 0, 1, 1], [], []>} : vector<8x64xf32>, vector<64x128xf32>, vector<8x128xf32> -> vector<8x128xf32>
    %38 = vector.broadcast %3 : vector<1x128xf32> to vector<8x128xf32>
    %39 = arith.addf %37, %38 : vector<8x128xf32>
    %40 = vector.extract_strided_slice %39 {offsets = [0, 0], sizes = [8, 96], strides = [1, 1]} : vector<8x128xf32> to vector<8x96xf32>
    %41 = arith.negf %40 : vector<8x96xf32>
    %42 = math.exp %41 : vector<8x96xf32>
    %cst_15 = arith.constant 1.000000e+00 : f32
    %43 = vector.broadcast %cst_15 : f32 to vector<8x96xf32>
    %44 = arith.addf %43, %42 : vector<8x96xf32>
    %45 = arith.divf %43, %44 : vector<8x96xf32>
    %46 = vector.extract_strided_slice %39 {offsets = [0, 96], sizes = [8, 32], strides = [1, 1]} : vector<8x128xf32> to vector<8x32xf32>
    %47 = math.tanh %46 : vector<8x32xf32>
    %48 = vector.extract_strided_slice %45 {offsets = [0, 0], sizes = [8, 32], strides = [1, 1]} : vector<8x96xf32> to vector<8x32xf32>
    %49 = vector.extract_strided_slice %45 {offsets = [0, 32], sizes = [8, 32], strides = [1, 1]} : vector<8x96xf32> to vector<8x32xf32>
    %50 = vector.extract_strided_slice %45 {offsets = [0, 64], sizes = [8, 32], strides = [1, 1]} : vector<8x96xf32> to vector<8x32xf32>
    %51 = arith.mulf %49, %26 : vector<8x32xf32>
    %52 = arith.mulf %48, %47 : vector<8x32xf32>
    %53 = arith.addf %51, %52 : vector<8x32xf32>
    %54 = math.tanh %53 : vector<8x32xf32>
    %55 = arith.mulf %50, %54 : vector<8x32xf32>
    %56 = arith.index_cast %c1_i32 : i32 to index
    %c0_16 = arith.constant 0 : index
    %c0_17 = arith.constant 0 : index
    %57 = vector.load %arg4[%56, %c0_16, %c0_17] : memref<8x8x32xf32, #tpu.memory_space<vmem>>, vector<1x8x32xf32>
    %58 = vector.shape_cast %57 : vector<1x8x32xf32> to vector<8x32xf32>
    %59 = vector.shape_cast %55 : vector<8x32xf32> to vector<1x8x32xf32>
    tpu.vector_store %arg4[%56, %c0_16, %c0_17], %59 {strides = array<i32>} : memref<8x8x32xf32, #tpu.memory_space<vmem>>, vector<1x8x32xf32>,
    %c2_i32 = arith.constant 2 : i32
    %60 = arith.index_cast %c2_i32 : i32 to index
    %c0_18 = arith.constant 0 : index
    %c0_19 = arith.constant 0 : index
    %61 = vector.load %arg0[%60, %c0_18, %c0_19] : memref<8x8x32xf32, #tpu.memory_space<vmem>>, vector<1x8x32xf32>
    %62 = vector.shape_cast %61 : vector<1x8x32xf32> to vector<8x32xf32>
    %63 = tpu.concatenate %62, %55 in 1 : vector<8x32xf32>, vector<8x32xf32> -> vector<8x64xf32>
    %cst_20 = arith.constant dense<0.000000e+00> : vector<8x128xf32>
    %64 = tpu.matmul %63, %1, %cst_20 {dimension_numbers = #tpu.dot_dimension_numbers<[1], [0], [0], [1], [0, 0, 1, 1], [], []>} : vector<8x64xf32>, vector<64x128xf32>, vector<8x128xf32> -> vector<8x128xf32>
    %65 = vector.broadcast %3 : vector<1x128xf32> to vector<8x128xf32>
    %66 = arith.addf %64, %65 : vector<8x128xf32>
    %67 = vector.extract_strided_slice %66 {offsets = [0, 0], sizes = [8, 96], strides = [1, 1]} : vector<8x128xf32> to vector<8x96xf32>
    %68 = arith.negf %67 : vector<8x96xf32>
    %69 = math.exp %68 : vector<8x96xf32>
    %cst_21 = arith.constant 1.000000e+00 : f32
    %70 = vector.broadcast %cst_21 : f32 to vector<8x96xf32>
    %71 = arith.addf %70, %69 : vector<8x96xf32>
    %72 = arith.divf %70, %71 : vector<8x96xf32>
    %73 = vector.extract_strided_slice %66 {offsets = [0, 96], sizes = [8, 32], strides = [1, 1]} : vector<8x128xf32> to vector<8x32xf32>
    %74 = math.tanh %73 : vector<8x32xf32>
    %75 = vector.extract_strided_slice %72 {offsets = [0, 0], sizes = [8, 32], strides = [1, 1]} : vector<8x96xf32> to vector<8x32xf32>
    %76 = vector.extract_strided_slice %72 {offsets = [0, 32], sizes = [8, 32], strides = [1, 1]} : vector<8x96xf32> to vector<8x32xf32>
    %77 = vector.extract_strided_slice %72 {offsets = [0, 64], sizes = [8, 32], strides = [1, 1]} : vector<8x96xf32> to vector<8x32xf32>
    %78 = arith.mulf %76, %53 : vector<8x32xf32>
    %79 = arith.mulf %75, %74 : vector<8x32xf32>
    %80 = arith.addf %78, %79 : vector<8x32xf32>
    %81 = math.tanh %80 : vector<8x32xf32>
    %82 = arith.mulf %77, %81 : vector<8x32xf32>
    %83 = arith.index_cast %c2_i32 : i32 to index
    %c0_22 = arith.constant 0 : index
    %c0_23 = arith.constant 0 : index
    %84 = vector.load %arg4[%83, %c0_22, %c0_23] : memref<8x8x32xf32, #tpu.memory_space<vmem>>, vector<1x8x32xf32>
    %85 = vector.shape_cast %84 : vector<1x8x32xf32> to vector<8x32xf32>
    %86 = vector.shape_cast %82 : vector<8x32xf32> to vector<1x8x32xf32>
    tpu.vector_store %arg4[%83, %c0_22, %c0_23], %86 {strides = array<i32>} : memref<8x8x32xf32, #tpu.memory_space<vmem>>, vector<1x8x32xf32>,
    %c3_i32 = arith.constant 3 : i32
    %87 = arith.index_cast %c3_i32 : i32 to index
    %c0_24 = arith.constant 0 : index
    %c0_25 = arith.constant 0 : index
    %88 = vector.load %arg0[%87, %c0_24, %c0_25] : memref<8x8x32xf32, #tpu.memory_space<vmem>>, vector<1x8x32xf32>
    %89 = vector.shape_cast %88 : vector<1x8x32xf32> to vector<8x32xf32>
    %90 = tpu.concatenate %89, %82 in 1 : vector<8x32xf32>, vector<8x32xf32> -> vector<8x64xf32>
    %cst_26 = arith.constant dense<0.000000e+00> : vector<8x128xf32>
    %91 = tpu.matmul %90, %1, %cst_26 {dimension_numbers = #tpu.dot_dimension_numbers<[1], [0], [0], [1], [0, 0, 1, 1], [], []>} : vector<8x64xf32>, vector<64x128xf32>, vector<8x128xf32> -> vector<8x128xf32>
    %92 = vector.broadcast %3 : vector<1x128xf32> to vector<8x128xf32>
    %93 = arith.addf %91, %92 : vector<8x128xf32>
    %94 = vector.extract_strided_slice %93 {offsets = [0, 0], sizes = [8, 96], strides = [1, 1]} : vector<8x128xf32> to vector<8x96xf32>
    %95 = arith.negf %94 : vector<8x96xf32>
    %96 = math.exp %95 : vector<8x96xf32>
    %cst_27 = arith.constant 1.000000e+00 : f32
    %97 = vector.broadcast %cst_27 : f32 to vector<8x96xf32>
    %98 = arith.addf %97, %96 : vector<8x96xf32>
    %99 = arith.divf %97, %98 : vector<8x96xf32>
    %100 = vector.extract_strided_slice %93 {offsets = [0, 96], sizes = [8, 32], strides = [1, 1]} : vector<8x128xf32> to vector<8x32xf32>
    %101 = math.tanh %100 : vector<8x32xf32>
    %102 = vector.extract_strided_slice %99 {offsets = [0, 0], sizes = [8, 32], strides = [1, 1]} : vector<8x96xf32> to vector<8x32xf32>
    %103 = vector.extract_strided_slice %99 {offsets = [0, 32], sizes = [8, 32], strides = [1, 1]} : vector<8x96xf32> to vector<8x32xf32>
    %104 = vector.extract_strided_slice %99 {offsets = [0, 64], sizes = [8, 32], strides = [1, 1]} : vector<8x96xf32> to vector<8x32xf32>
    %105 = arith.mulf %103, %80 : vector<8x32xf32>
    %106 = arith.mulf %102, %101 : vector<8x32xf32>
    %107 = arith.addf %105, %106 : vector<8x32xf32>
    %108 = math.tanh %107 : vector<8x32xf32>
    %109 = arith.mulf %104, %108 : vector<8x32xf32>
    %110 = arith.index_cast %c3_i32 : i32 to index
    %c0_28 = arith.constant 0 : index
    %c0_29 = arith.constant 0 : index
    %111 = vector.load %arg4[%110, %c0_28, %c0_29] : memref<8x8x32xf32, #tpu.memory_space<vmem>>, vector<1x8x32xf32>
    %112 = vector.shape_cast %111 : vector<1x8x32xf32> to vector<8x32xf32>
    %113 = vector.shape_cast %109 : vector<8x32xf32> to vector<1x8x32xf32>
    tpu.vector_store %arg4[%110, %c0_28, %c0_29], %113 {strides = array<i32>} : memref<8x8x32xf32, #tpu.memory_space<vmem>>, vector<1x8x32xf32>,
    %c4_i32 = arith.constant 4 : i32
    %114 = arith.index_cast %c4_i32 : i32 to index
    %c0_30 = arith.constant 0 : index
    %c0_31 = arith.constant 0 : index
    %115 = vector.load %arg0[%114, %c0_30, %c0_31] : memref<8x8x32xf32, #tpu.memory_space<vmem>>, vector<1x8x32xf32>
    %116 = vector.shape_cast %115 : vector<1x8x32xf32> to vector<8x32xf32>
    %117 = tpu.concatenate %116, %109 in 1 : vector<8x32xf32>, vector<8x32xf32> -> vector<8x64xf32>
    %cst_32 = arith.constant dense<0.000000e+00> : vector<8x128xf32>
    %118 = tpu.matmul %117, %1, %cst_32 {dimension_numbers = #tpu.dot_dimension_numbers<[1], [0], [0], [1], [0, 0, 1, 1], [], []>} : vector<8x64xf32>, vector<64x128xf32>, vector<8x128xf32> -> vector<8x128xf32>
    %119 = vector.broadcast %3 : vector<1x128xf32> to vector<8x128xf32>
    %120 = arith.addf %118, %119 : vector<8x128xf32>
    %121 = vector.extract_strided_slice %120 {offsets = [0, 0], sizes = [8, 96], strides = [1, 1]} : vector<8x128xf32> to vector<8x96xf32>
    %122 = arith.negf %121 : vector<8x96xf32>
    %123 = math.exp %122 : vector<8x96xf32>
    %cst_33 = arith.constant 1.000000e+00 : f32
    %124 = vector.broadcast %cst_33 : f32 to vector<8x96xf32>
    %125 = arith.addf %124, %123 : vector<8x96xf32>
    %126 = arith.divf %124, %125 : vector<8x96xf32>
    %127 = vector.extract_strided_slice %120 {offsets = [0, 96], sizes = [8, 32], strides = [1, 1]} : vector<8x128xf32> to vector<8x32xf32>
    %128 = math.tanh %127 : vector<8x32xf32>
    %129 = vector.extract_strided_slice %126 {offsets = [0, 0], sizes = [8, 32], strides = [1, 1]} : vector<8x96xf32> to vector<8x32xf32>
    %130 = vector.extract_strided_slice %126 {offsets = [0, 32], sizes = [8, 32], strides = [1, 1]} : vector<8x96xf32> to vector<8x32xf32>
    %131 = vector.extract_strided_slice %126 {offsets = [0, 64], sizes = [8, 32], strides = [1, 1]} : vector<8x96xf32> to vector<8x32xf32>
    %132 = arith.mulf %130, %107 : vector<8x32xf32>
    %133 = arith.mulf %129, %128 : vector<8x32xf32>
    %134 = arith.addf %132, %133 : vector<8x32xf32>
    %135 = math.tanh %134 : vector<8x32xf32>
    %136 = arith.mulf %131, %135 : vector<8x32xf32>
    %137 = arith.index_cast %c4_i32 : i32 to index
    %c0_34 = arith.constant 0 : index
    %c0_35 = arith.constant 0 : index
    %138 = vector.load %arg4[%137, %c0_34, %c0_35] : memref<8x8x32xf32, #tpu.memory_space<vmem>>, vector<1x8x32xf32>
    %139 = vector.shape_cast %138 : vector<1x8x32xf32> to vector<8x32xf32>
    %140 = vector.shape_cast %136 : vector<8x32xf32> to vector<1x8x32xf32>
    tpu.vector_store %arg4[%137, %c0_34, %c0_35], %140 {strides = array<i32>} : memref<8x8x32xf32, #tpu.memory_space<vmem>>, vector<1x8x32xf32>,
    %c5_i32 = arith.constant 5 : i32
    %141 = arith.index_cast %c5_i32 : i32 to index
    %c0_36 = arith.constant 0 : index
    %c0_37 = arith.constant 0 : index
    %142 = vector.load %arg0[%141, %c0_36, %c0_37] : memref<8x8x32xf32, #tpu.memory_space<vmem>>, vector<1x8x32xf32>
    %143 = vector.shape_cast %142 : vector<1x8x32xf32> to vector<8x32xf32>
    %144 = tpu.concatenate %143, %136 in 1 : vector<8x32xf32>, vector<8x32xf32> -> vector<8x64xf32>
    %cst_38 = arith.constant dense<0.000000e+00> : vector<8x128xf32>
    %145 = tpu.matmul %144, %1, %cst_38 {dimension_numbers = #tpu.dot_dimension_numbers<[1], [0], [0], [1], [0, 0, 1, 1], [], []>} : vector<8x64xf32>, vector<64x128xf32>, vector<8x128xf32> -> vector<8x128xf32>
    %146 = vector.broadcast %3 : vector<1x128xf32> to vector<8x128xf32>
    %147 = arith.addf %145, %146 : vector<8x128xf32>
    %148 = vector.extract_strided_slice %147 {offsets = [0, 0], sizes = [8, 96], strides = [1, 1]} : vector<8x128xf32> to vector<8x96xf32>
    %149 = arith.negf %148 : vector<8x96xf32>
    %150 = math.exp %149 : vector<8x96xf32>
    %cst_39 = arith.constant 1.000000e+00 : f32
    %151 = vector.broadcast %cst_39 : f32 to vector<8x96xf32>
    %152 = arith.addf %151, %150 : vector<8x96xf32>
    %153 = arith.divf %151, %152 : vector<8x96xf32>
    %154 = vector.extract_strided_slice %147 {offsets = [0, 96], sizes = [8, 32], strides = [1, 1]} : vector<8x128xf32> to vector<8x32xf32>
    %155 = math.tanh %154 : vector<8x32xf32>
    %156 = vector.extract_strided_slice %153 {offsets = [0, 0], sizes = [8, 32], strides = [1, 1]} : vector<8x96xf32> to vector<8x32xf32>
    %157 = vector.extract_strided_slice %153 {offsets = [0, 32], sizes = [8, 32], strides = [1, 1]} : vector<8x96xf32> to vector<8x32xf32>
    %158 = vector.extract_strided_slice %153 {offsets = [0, 64], sizes = [8, 32], strides = [1, 1]} : vector<8x96xf32> to vector<8x32xf32>
    %159 = arith.mulf %157, %134 : vector<8x32xf32>
    %160 = arith.mulf %156, %155 : vector<8x32xf32>
    %161 = arith.addf %159, %160 : vector<8x32xf32>
    %162 = math.tanh %161 : vector<8x32xf32>
    %163 = arith.mulf %158, %162 : vector<8x32xf32>
    %164 = arith.index_cast %c5_i32 : i32 to index
    %c0_40 = arith.constant 0 : index
    %c0_41 = arith.constant 0 : index
    %165 = vector.load %arg4[%164, %c0_40, %c0_41] : memref<8x8x32xf32, #tpu.memory_space<vmem>>, vector<1x8x32xf32>
    %166 = vector.shape_cast %165 : vector<1x8x32xf32> to vector<8x32xf32>
    %167 = vector.shape_cast %163 : vector<8x32xf32> to vector<1x8x32xf32>
    tpu.vector_store %arg4[%164, %c0_40, %c0_41], %167 {strides = array<i32>} : memref<8x8x32xf32, #tpu.memory_space<vmem>>, vector<1x8x32xf32>,
    %c6_i32 = arith.constant 6 : i32
    %168 = arith.index_cast %c6_i32 : i32 to index
    %c0_42 = arith.constant 0 : index
    %c0_43 = arith.constant 0 : index
    %169 = vector.load %arg0[%168, %c0_42, %c0_43] : memref<8x8x32xf32, #tpu.memory_space<vmem>>, vector<1x8x32xf32>
    %170 = vector.shape_cast %169 : vector<1x8x32xf32> to vector<8x32xf32>
    %171 = tpu.concatenate %170, %163 in 1 : vector<8x32xf32>, vector<8x32xf32> -> vector<8x64xf32>
    %cst_44 = arith.constant dense<0.000000e+00> : vector<8x128xf32>
    %172 = tpu.matmul %171, %1, %cst_44 {dimension_numbers = #tpu.dot_dimension_numbers<[1], [0], [0], [1], [0, 0, 1, 1], [], []>} : vector<8x64xf32>, vector<64x128xf32>, vector<8x128xf32> -> vector<8x128xf32>
    %173 = vector.broadcast %3 : vector<1x128xf32> to vector<8x128xf32>
    %174 = arith.addf %172, %173 : vector<8x128xf32>
    %175 = vector.extract_strided_slice %174 {offsets = [0, 0], sizes = [8, 96], strides = [1, 1]} : vector<8x128xf32> to vector<8x96xf32>
    %176 = arith.negf %175 : vector<8x96xf32>
    %177 = math.exp %176 : vector<8x96xf32>
    %cst_45 = arith.constant 1.000000e+00 : f32
    %178 = vector.broadcast %cst_45 : f32 to vector<8x96xf32>
    %179 = arith.addf %178, %177 : vector<8x96xf32>
    %180 = arith.divf %178, %179 : vector<8x96xf32>
    %181 = vector.extract_strided_slice %174 {offsets = [0, 96], sizes = [8, 32], strides = [1, 1]} : vector<8x128xf32> to vector<8x32xf32>
    %182 = math.tanh %181 : vector<8x32xf32>
    %183 = vector.extract_strided_slice %180 {offsets = [0, 0], sizes = [8, 32], strides = [1, 1]} : vector<8x96xf32> to vector<8x32xf32>
    %184 = vector.extract_strided_slice %180 {offsets = [0, 32], sizes = [8, 32], strides = [1, 1]} : vector<8x96xf32> to vector<8x32xf32>
    %185 = vector.extract_strided_slice %180 {offsets = [0, 64], sizes = [8, 32], strides = [1, 1]} : vector<8x96xf32> to vector<8x32xf32>
    %186 = arith.mulf %184, %161 : vector<8x32xf32>
    %187 = arith.mulf %183, %182 : vector<8x32xf32>
    %188 = arith.addf %186, %187 : vector<8x32xf32>
    %189 = math.tanh %188 : vector<8x32xf32>
    %190 = arith.mulf %185, %189 : vector<8x32xf32>
    %191 = arith.index_cast %c6_i32 : i32 to index
    %c0_46 = arith.constant 0 : index
    %c0_47 = arith.constant 0 : index
    %192 = vector.load %arg4[%191, %c0_46, %c0_47] : memref<8x8x32xf32, #tpu.memory_space<vmem>>, vector<1x8x32xf32>
    %193 = vector.shape_cast %192 : vector<1x8x32xf32> to vector<8x32xf32>
    %194 = vector.shape_cast %190 : vector<8x32xf32> to vector<1x8x32xf32>
    tpu.vector_store %arg4[%191, %c0_46, %c0_47], %194 {strides = array<i32>} : memref<8x8x32xf32, #tpu.memory_space<vmem>>, vector<1x8x32xf32>,
    %c7_i32 = arith.constant 7 : i32
    %195 = arith.index_cast %c7_i32 : i32 to index
    %c0_48 = arith.constant 0 : index
    %c0_49 = arith.constant 0 : index
    %196 = vector.load %arg0[%195, %c0_48, %c0_49] : memref<8x8x32xf32, #tpu.memory_space<vmem>>, vector<1x8x32xf32>
    %197 = vector.shape_cast %196 : vector<1x8x32xf32> to vector<8x32xf32>
    %198 = tpu.concatenate %197, %190 in 1 : vector<8x32xf32>, vector<8x32xf32> -> vector<8x64xf32>
    %cst_50 = arith.constant dense<0.000000e+00> : vector<8x128xf32>
    %199 = tpu.matmul %198, %1, %cst_50 {dimension_numbers = #tpu.dot_dimension_numbers<[1], [0], [0], [1], [0, 0, 1, 1], [], []>} : vector<8x64xf32>, vector<64x128xf32>, vector<8x128xf32> -> vector<8x128xf32>
    %200 = vector.broadcast %3 : vector<1x128xf32> to vector<8x128xf32>
    %201 = arith.addf %199, %200 : vector<8x128xf32>
    %202 = vector.extract_strided_slice %201 {offsets = [0, 0], sizes = [8, 96], strides = [1, 1]} : vector<8x128xf32> to vector<8x96xf32>
    %203 = arith.negf %202 : vector<8x96xf32>
    %204 = math.exp %203 : vector<8x96xf32>
    %cst_51 = arith.constant 1.000000e+00 : f32
    %205 = vector.broadcast %cst_51 : f32 to vector<8x96xf32>
    %206 = arith.addf %205, %204 : vector<8x96xf32>
    %207 = arith.divf %205, %206 : vector<8x96xf32>
    %208 = vector.extract_strided_slice %201 {offsets = [0, 96], sizes = [8, 32], strides = [1, 1]} : vector<8x128xf32> to vector<8x32xf32>
    %209 = math.tanh %208 : vector<8x32xf32>
    %210 = vector.extract_strided_slice %207 {offsets = [0, 0], sizes = [8, 32], strides = [1, 1]} : vector<8x96xf32> to vector<8x32xf32>
    %211 = vector.extract_strided_slice %207 {offsets = [0, 32], sizes = [8, 32], strides = [1, 1]} : vector<8x96xf32> to vector<8x32xf32>
    %212 = vector.extract_strided_slice %207 {offsets = [0, 64], sizes = [8, 32], strides = [1, 1]} : vector<8x96xf32> to vector<8x32xf32>
    %213 = arith.mulf %211, %188 : vector<8x32xf32>
    %214 = arith.mulf %210, %209 : vector<8x32xf32>
    %215 = arith.addf %213, %214 : vector<8x32xf32>
    %216 = math.tanh %215 : vector<8x32xf32>
    %217 = arith.mulf %212, %216 : vector<8x32xf32>
    %218 = arith.index_cast %c7_i32 : i32 to index
    %c0_52 = arith.constant 0 : index
    %c0_53 = arith.constant 0 : index
    %219 = vector.load %arg4[%218, %c0_52, %c0_53] : memref<8x8x32xf32, #tpu.memory_space<vmem>>, vector<1x8x32xf32>
    %220 = vector.shape_cast %219 : vector<1x8x32xf32> to vector<8x32xf32>
    %221 = vector.shape_cast %217 : vector<8x32xf32> to vector<1x8x32xf32>
    tpu.vector_store %arg4[%218, %c0_52, %c0_53], %221 {strides = array<i32>} : memref<8x8x32xf32, #tpu.memory_space<vmem>>, vector<1x8x32xf32>,
    %c8_i32 = arith.constant 8 : i32
    %c1 = arith.constant 1 : index
    %c0_54 = arith.constant 0 : index
    %c0_55 = arith.constant 0 : index
    %222 = vector.load %arg1[%c1, %c0_54, %c0_55] : memref<2x64x128xf32, #tpu.memory_space<vmem>>, vector<1x64x128xf32>
    %223 = vector.shape_cast %222 : vector<1x64x128xf32> to vector<64x128xf32>
    %c1_56 = arith.constant 1 : index
    %c0_57 = arith.constant 0 : index
    %c0_58 = arith.constant 0 : index
    %224 = vector.load %arg2[%c1_56, %c0_57, %c0_58] : memref<2x1x128xf32, #tpu.memory_space<vmem>>, vector<1x1x128xf32>
    %225 = vector.shape_cast %224 : vector<1x1x128xf32> to vector<1x128xf32>
    %cst_59 = arith.constant 0.000000e+00 : f32
    %226 = vector.broadcast %cst_59 : f32 to vector<8x32xf32>
    %cst_60 = arith.constant 0.000000e+00 : f32
    %227 = vector.broadcast %cst_60 : f32 to vector<8x32xf32>
    %c0_i32_61 = arith.constant 0 : i32
    %228 = arith.index_cast %c0_i32_61 : i32 to index
    %c0_62 = arith.constant 0 : index
    %c0_63 = arith.constant 0 : index
    %229 = vector.load %arg4[%228, %c0_62, %c0_63] : memref<8x8x32xf32, #tpu.memory_space<vmem>>, vector<1x8x32xf32>
    %230 = vector.shape_cast %229 : vector<1x8x32xf32> to vector<8x32xf32>
    %231 = tpu.concatenate %230, %226 in 1 : vector<8x32xf32>, vector<8x32xf32> -> vector<8x64xf32>
    %cst_64 = arith.constant dense<0.000000e+00> : vector<8x128xf32>
    %232 = tpu.matmul %231, %223, %cst_64 {dimension_numbers = #tpu.dot_dimension_numbers<[1], [0], [0], [1], [0, 0, 1, 1], [], []>} : vector<8x64xf32>, vector<64x128xf32>, vector<8x128xf32> -> vector<8x128xf32>
    %233 = vector.broadcast %225 : vector<1x128xf32> to vector<8x128xf32>
    %234 = arith.addf %232, %233 : vector<8x128xf32>
    %235 = vector.extract_strided_slice %234 {offsets = [0, 0], sizes = [8, 96], strides = [1, 1]} : vector<8x128xf32> to vector<8x96xf32>
    %236 = arith.negf %235 : vector<8x96xf32>
    %237 = math.exp %236 : vector<8x96xf32>
    %cst_65 = arith.constant 1.000000e+00 : f32
    %238 = vector.broadcast %cst_65 : f32 to vector<8x96xf32>
    %239 = arith.addf %238, %237 : vector<8x96xf32>
    %240 = arith.divf %238, %239 : vector<8x96xf32>
    %241 = vector.extract_strided_slice %234 {offsets = [0, 96], sizes = [8, 32], strides = [1, 1]} : vector<8x128xf32> to vector<8x32xf32>
    %242 = math.tanh %241 : vector<8x32xf32>
    %243 = vector.extract_strided_slice %240 {offsets = [0, 0], sizes = [8, 32], strides = [1, 1]} : vector<8x96xf32> to vector<8x32xf32>
    %244 = vector.extract_strided_slice %240 {offsets = [0, 32], sizes = [8, 32], strides = [1, 1]} : vector<8x96xf32> to vector<8x32xf32>
    %245 = vector.extract_strided_slice %240 {offsets = [0, 64], sizes = [8, 32], strides = [1, 1]} : vector<8x96xf32> to vector<8x32xf32>
    %246 = arith.mulf %244, %227 : vector<8x32xf32>
    %247 = arith.mulf %243, %242 : vector<8x32xf32>
    %248 = arith.addf %246, %247 : vector<8x32xf32>
    %249 = math.tanh %248 : vector<8x32xf32>
    %250 = arith.mulf %245, %249 : vector<8x32xf32>
    %c1_i32_66 = arith.constant 1 : i32
    %251 = arith.index_cast %c1_i32_66 : i32 to index
    %c0_67 = arith.constant 0 : index
    %c0_68 = arith.constant 0 : index
    %252 = vector.load %arg4[%251, %c0_67, %c0_68] : memref<8x8x32xf32, #tpu.memory_space<vmem>>, vector<1x8x32xf32>
    %253 = vector.shape_cast %252 : vector<1x8x32xf32> to vector<8x32xf32>
    %254 = tpu.concatenate %253, %250 in 1 : vector<8x32xf32>, vector<8x32xf32> -> vector<8x64xf32>
    %cst_69 = arith.constant dense<0.000000e+00> : vector<8x128xf32>
    %255 = tpu.matmul %254, %223, %cst_69 {dimension_numbers = #tpu.dot_dimension_numbers<[1], [0], [0], [1], [0, 0, 1, 1], [], []>} : vector<8x64xf32>, vector<64x128xf32>, vector<8x128xf32> -> vector<8x128xf32>
    %256 = vector.broadcast %225 : vector<1x128xf32> to vector<8x128xf32>
    %257 = arith.addf %255, %256 : vector<8x128xf32>
    %258 = vector.extract_strided_slice %257 {offsets = [0, 0], sizes = [8, 96], strides = [1, 1]} : vector<8x128xf32> to vector<8x96xf32>
    %259 = arith.negf %258 : vector<8x96xf32>
    %260 = math.exp %259 : vector<8x96xf32>
    %cst_70 = arith.constant 1.000000e+00 : f32
    %261 = vector.broadcast %cst_70 : f32 to vector<8x96xf32>
    %262 = arith.addf %261, %260 : vector<8x96xf32>
    %263 = arith.divf %261, %262 : vector<8x96xf32>
    %264 = vector.extract_strided_slice %257 {offsets = [0, 96], sizes = [8, 32], strides = [1, 1]} : vector<8x128xf32> to vector<8x32xf32>
    %265 = math.tanh %264 : vector<8x32xf32>
    %266 = vector.extract_strided_slice %263 {offsets = [0, 0], sizes = [8, 32], strides = [1, 1]} : vector<8x96xf32> to vector<8x32xf32>
    %267 = vector.extract_strided_slice %263 {offsets = [0, 32], sizes = [8, 32], strides = [1, 1]} : vector<8x96xf32> to vector<8x32xf32>
    %268 = vector.extract_strided_slice %263 {offsets = [0, 64], sizes = [8, 32], strides = [1, 1]} : vector<8x96xf32> to vector<8x32xf32>
    %269 = arith.mulf %267, %248 : vector<8x32xf32>
    %270 = arith.mulf %266, %265 : vector<8x32xf32>
    %271 = arith.addf %269, %270 : vector<8x32xf32>
    %272 = math.tanh %271 : vector<8x32xf32>
    %273 = arith.mulf %268, %272 : vector<8x32xf32>
    %c2_i32_71 = arith.constant 2 : i32
    %274 = arith.index_cast %c2_i32_71 : i32 to index
    %c0_72 = arith.constant 0 : index
    %c0_73 = arith.constant 0 : index
    %275 = vector.load %arg4[%274, %c0_72, %c0_73] : memref<8x8x32xf32, #tpu.memory_space<vmem>>, vector<1x8x32xf32>
    %276 = vector.shape_cast %275 : vector<1x8x32xf32> to vector<8x32xf32>
    %277 = tpu.concatenate %276, %273 in 1 : vector<8x32xf32>, vector<8x32xf32> -> vector<8x64xf32>
    %cst_74 = arith.constant dense<0.000000e+00> : vector<8x128xf32>
    %278 = tpu.matmul %277, %223, %cst_74 {dimension_numbers = #tpu.dot_dimension_numbers<[1], [0], [0], [1], [0, 0, 1, 1], [], []>} : vector<8x64xf32>, vector<64x128xf32>, vector<8x128xf32> -> vector<8x128xf32>
    %279 = vector.broadcast %225 : vector<1x128xf32> to vector<8x128xf32>
    %280 = arith.addf %278, %279 : vector<8x128xf32>
    %281 = vector.extract_strided_slice %280 {offsets = [0, 0], sizes = [8, 96], strides = [1, 1]} : vector<8x128xf32> to vector<8x96xf32>
    %282 = arith.negf %281 : vector<8x96xf32>
    %283 = math.exp %282 : vector<8x96xf32>
    %cst_75 = arith.constant 1.000000e+00 : f32
    %284 = vector.broadcast %cst_75 : f32 to vector<8x96xf32>
    %285 = arith.addf %284, %283 : vector<8x96xf32>
    %286 = arith.divf %284, %285 : vector<8x96xf32>
    %287 = vector.extract_strided_slice %280 {offsets = [0, 96], sizes = [8, 32], strides = [1, 1]} : vector<8x128xf32> to vector<8x32xf32>
    %288 = math.tanh %287 : vector<8x32xf32>
    %289 = vector.extract_strided_slice %286 {offsets = [0, 0], sizes = [8, 32], strides = [1, 1]} : vector<8x96xf32> to vector<8x32xf32>
    %290 = vector.extract_strided_slice %286 {offsets = [0, 32], sizes = [8, 32], strides = [1, 1]} : vector<8x96xf32> to vector<8x32xf32>
    %291 = vector.extract_strided_slice %286 {offsets = [0, 64], sizes = [8, 32], strides = [1, 1]} : vector<8x96xf32> to vector<8x32xf32>
    %292 = arith.mulf %290, %271 : vector<8x32xf32>
    %293 = arith.mulf %289, %288 : vector<8x32xf32>
    %294 = arith.addf %292, %293 : vector<8x32xf32>
    %295 = math.tanh %294 : vector<8x32xf32>
    %296 = arith.mulf %291, %295 : vector<8x32xf32>
    %c3_i32_76 = arith.constant 3 : i32
    %297 = arith.index_cast %c3_i32_76 : i32 to index
    %c0_77 = arith.constant 0 : index
    %c0_78 = arith.constant 0 : index
    %298 = vector.load %arg4[%297, %c0_77, %c0_78] : memref<8x8x32xf32, #tpu.memory_space<vmem>>, vector<1x8x32xf32>
    %299 = vector.shape_cast %298 : vector<1x8x32xf32> to vector<8x32xf32>
    %300 = tpu.concatenate %299, %296 in 1 : vector<8x32xf32>, vector<8x32xf32> -> vector<8x64xf32>
    %cst_79 = arith.constant dense<0.000000e+00> : vector<8x128xf32>
    %301 = tpu.matmul %300, %223, %cst_79 {dimension_numbers = #tpu.dot_dimension_numbers<[1], [0], [0], [1], [0, 0, 1, 1], [], []>} : vector<8x64xf32>, vector<64x128xf32>, vector<8x128xf32> -> vector<8x128xf32>
    %302 = vector.broadcast %225 : vector<1x128xf32> to vector<8x128xf32>
    %303 = arith.addf %301, %302 : vector<8x128xf32>
    %304 = vector.extract_strided_slice %303 {offsets = [0, 0], sizes = [8, 96], strides = [1, 1]} : vector<8x128xf32> to vector<8x96xf32>
    %305 = arith.negf %304 : vector<8x96xf32>
    %306 = math.exp %305 : vector<8x96xf32>
    %cst_80 = arith.constant 1.000000e+00 : f32
    %307 = vector.broadcast %cst_80 : f32 to vector<8x96xf32>
    %308 = arith.addf %307, %306 : vector<8x96xf32>
    %309 = arith.divf %307, %308 : vector<8x96xf32>
    %310 = vector.extract_strided_slice %303 {offsets = [0, 96], sizes = [8, 32], strides = [1, 1]} : vector<8x128xf32> to vector<8x32xf32>
    %311 = math.tanh %310 : vector<8x32xf32>
    %312 = vector.extract_strided_slice %309 {offsets = [0, 0], sizes = [8, 32], strides = [1, 1]} : vector<8x96xf32> to vector<8x32xf32>
    %313 = vector.extract_strided_slice %309 {offsets = [0, 32], sizes = [8, 32], strides = [1, 1]} : vector<8x96xf32> to vector<8x32xf32>
    %314 = vector.extract_strided_slice %309 {offsets = [0, 64], sizes = [8, 32], strides = [1, 1]} : vector<8x96xf32> to vector<8x32xf32>
    %315 = arith.mulf %313, %294 : vector<8x32xf32>
    %316 = arith.mulf %312, %311 : vector<8x32xf32>
    %317 = arith.addf %315, %316 : vector<8x32xf32>
    %318 = math.tanh %317 : vector<8x32xf32>
    %319 = arith.mulf %314, %318 : vector<8x32xf32>
    %c4_i32_81 = arith.constant 4 : i32
    %320 = arith.index_cast %c4_i32_81 : i32 to index
    %c0_82 = arith.constant 0 : index
    %c0_83 = arith.constant 0 : index
    %321 = vector.load %arg4[%320, %c0_82, %c0_83] : memref<8x8x32xf32, #tpu.memory_space<vmem>>, vector<1x8x32xf32>
    %322 = vector.shape_cast %321 : vector<1x8x32xf32> to vector<8x32xf32>
    %323 = tpu.concatenate %322, %319 in 1 : vector<8x32xf32>, vector<8x32xf32> -> vector<8x64xf32>
    %cst_84 = arith.constant dense<0.000000e+00> : vector<8x128xf32>
    %324 = tpu.matmul %323, %223, %cst_84 {dimension_numbers = #tpu.dot_dimension_numbers<[1], [0], [0], [1], [0, 0, 1, 1], [], []>} : vector<8x64xf32>, vector<64x128xf32>, vector<8x128xf32> -> vector<8x128xf32>
    %325 = vector.broadcast %225 : vector<1x128xf32> to vector<8x128xf32>
    %326 = arith.addf %324, %325 : vector<8x128xf32>
    %327 = vector.extract_strided_slice %326 {offsets = [0, 0], sizes = [8, 96], strides = [1, 1]} : vector<8x128xf32> to vector<8x96xf32>
    %328 = arith.negf %327 : vector<8x96xf32>
    %329 = math.exp %328 : vector<8x96xf32>
    %cst_85 = arith.constant 1.000000e+00 : f32
    %330 = vector.broadcast %cst_85 : f32 to vector<8x96xf32>
    %331 = arith.addf %330, %329 : vector<8x96xf32>
    %332 = arith.divf %330, %331 : vector<8x96xf32>
    %333 = vector.extract_strided_slice %326 {offsets = [0, 96], sizes = [8, 32], strides = [1, 1]} : vector<8x128xf32> to vector<8x32xf32>
    %334 = math.tanh %333 : vector<8x32xf32>
    %335 = vector.extract_strided_slice %332 {offsets = [0, 0], sizes = [8, 32], strides = [1, 1]} : vector<8x96xf32> to vector<8x32xf32>
    %336 = vector.extract_strided_slice %332 {offsets = [0, 32], sizes = [8, 32], strides = [1, 1]} : vector<8x96xf32> to vector<8x32xf32>
    %337 = vector.extract_strided_slice %332 {offsets = [0, 64], sizes = [8, 32], strides = [1, 1]} : vector<8x96xf32> to vector<8x32xf32>
    %338 = arith.mulf %336, %317 : vector<8x32xf32>
    %339 = arith.mulf %335, %334 : vector<8x32xf32>
    %340 = arith.addf %338, %339 : vector<8x32xf32>
    %341 = math.tanh %340 : vector<8x32xf32>
    %342 = arith.mulf %337, %341 : vector<8x32xf32>
    %c5_i32_86 = arith.constant 5 : i32
    %343 = arith.index_cast %c5_i32_86 : i32 to index
    %c0_87 = arith.constant 0 : index
    %c0_88 = arith.constant 0 : index
    %344 = vector.load %arg4[%343, %c0_87, %c0_88] : memref<8x8x32xf32, #tpu.memory_space<vmem>>, vector<1x8x32xf32>
    %345 = vector.shape_cast %344 : vector<1x8x32xf32> to vector<8x32xf32>
    %346 = tpu.concatenate %345, %342 in 1 : vector<8x32xf32>, vector<8x32xf32> -> vector<8x64xf32>
    %cst_89 = arith.constant dense<0.000000e+00> : vector<8x128xf32>
    %347 = tpu.matmul %346, %223, %cst_89 {dimension_numbers = #tpu.dot_dimension_numbers<[1], [0], [0], [1], [0, 0, 1, 1], [], []>} : vector<8x64xf32>, vector<64x128xf32>, vector<8x128xf32> -> vector<8x128xf32>
    %348 = vector.broadcast %225 : vector<1x128xf32> to vector<8x128xf32>
    %349 = arith.addf %347, %348 : vector<8x128xf32>
    %350 = vector.extract_strided_slice %349 {offsets = [0, 0], sizes = [8, 96], strides = [1, 1]} : vector<8x128xf32> to vector<8x96xf32>
    %351 = arith.negf %350 : vector<8x96xf32>
    %352 = math.exp %351 : vector<8x96xf32>
    %cst_90 = arith.constant 1.000000e+00 : f32
    %353 = vector.broadcast %cst_90 : f32 to vector<8x96xf32>
    %354 = arith.addf %353, %352 : vector<8x96xf32>
    %355 = arith.divf %353, %354 : vector<8x96xf32>
    %356 = vector.extract_strided_slice %349 {offsets = [0, 96], sizes = [8, 32], strides = [1, 1]} : vector<8x128xf32> to vector<8x32xf32>
    %357 = math.tanh %356 : vector<8x32xf32>
    %358 = vector.extract_strided_slice %355 {offsets = [0, 0], sizes = [8, 32], strides = [1, 1]} : vector<8x96xf32> to vector<8x32xf32>
    %359 = vector.extract_strided_slice %355 {offsets = [0, 32], sizes = [8, 32], strides = [1, 1]} : vector<8x96xf32> to vector<8x32xf32>
    %360 = vector.extract_strided_slice %355 {offsets = [0, 64], sizes = [8, 32], strides = [1, 1]} : vector<8x96xf32> to vector<8x32xf32>
    %361 = arith.mulf %359, %340 : vector<8x32xf32>
    %362 = arith.mulf %358, %357 : vector<8x32xf32>
    %363 = arith.addf %361, %362 : vector<8x32xf32>
    %364 = math.tanh %363 : vector<8x32xf32>
    %365 = arith.mulf %360, %364 : vector<8x32xf32>
    %c6_i32_91 = arith.constant 6 : i32
    %366 = arith.index_cast %c6_i32_91 : i32 to index
    %c0_92 = arith.constant 0 : index
    %c0_93 = arith.constant 0 : index
    %367 = vector.load %arg4[%366, %c0_92, %c0_93] : memref<8x8x32xf32, #tpu.memory_space<vmem>>, vector<1x8x32xf32>
    %368 = vector.shape_cast %367 : vector<1x8x32xf32> to vector<8x32xf32>
    %369 = tpu.concatenate %368, %365 in 1 : vector<8x32xf32>, vector<8x32xf32> -> vector<8x64xf32>
    %cst_94 = arith.constant dense<0.000000e+00> : vector<8x128xf32>
    %370 = tpu.matmul %369, %223, %cst_94 {dimension_numbers = #tpu.dot_dimension_numbers<[1], [0], [0], [1], [0, 0, 1, 1], [], []>} : vector<8x64xf32>, vector<64x128xf32>, vector<8x128xf32> -> vector<8x128xf32>
    %371 = vector.broadcast %225 : vector<1x128xf32> to vector<8x128xf32>
    %372 = arith.addf %370, %371 : vector<8x128xf32>
    %373 = vector.extract_strided_slice %372 {offsets = [0, 0], sizes = [8, 96], strides = [1, 1]} : vector<8x128xf32> to vector<8x96xf32>
    %374 = arith.negf %373 : vector<8x96xf32>
    %375 = math.exp %374 : vector<8x96xf32>
    %cst_95 = arith.constant 1.000000e+00 : f32
    %376 = vector.broadcast %cst_95 : f32 to vector<8x96xf32>
    %377 = arith.addf %376, %375 : vector<8x96xf32>
    %378 = arith.divf %376, %377 : vector<8x96xf32>
    %379 = vector.extract_strided_slice %372 {offsets = [0, 96], sizes = [8, 32], strides = [1, 1]} : vector<8x128xf32> to vector<8x32xf32>
    %380 = math.tanh %379 : vector<8x32xf32>
    %381 = vector.extract_strided_slice %378 {offsets = [0, 0], sizes = [8, 32], strides = [1, 1]} : vector<8x96xf32> to vector<8x32xf32>
    %382 = vector.extract_strided_slice %378 {offsets = [0, 32], sizes = [8, 32], strides = [1, 1]} : vector<8x96xf32> to vector<8x32xf32>
    %383 = vector.extract_strided_slice %378 {offsets = [0, 64], sizes = [8, 32], strides = [1, 1]} : vector<8x96xf32> to vector<8x32xf32>
    %384 = arith.mulf %382, %363 : vector<8x32xf32>
    %385 = arith.mulf %381, %380 : vector<8x32xf32>
    %386 = arith.addf %384, %385 : vector<8x32xf32>
    %387 = math.tanh %386 : vector<8x32xf32>
    %388 = arith.mulf %383, %387 : vector<8x32xf32>
    %c7_i32_96 = arith.constant 7 : i32
    %389 = arith.index_cast %c7_i32_96 : i32 to index
    %c0_97 = arith.constant 0 : index
    %c0_98 = arith.constant 0 : index
    %390 = vector.load %arg4[%389, %c0_97, %c0_98] : memref<8x8x32xf32, #tpu.memory_space<vmem>>, vector<1x8x32xf32>
    %391 = vector.shape_cast %390 : vector<1x8x32xf32> to vector<8x32xf32>
    %392 = tpu.concatenate %391, %388 in 1 : vector<8x32xf32>, vector<8x32xf32> -> vector<8x64xf32>
    %cst_99 = arith.constant dense<0.000000e+00> : vector<8x128xf32>
    %393 = tpu.matmul %392, %223, %cst_99 {dimension_numbers = #tpu.dot_dimension_numbers<[1], [0], [0], [1], [0, 0, 1, 1], [], []>} : vector<8x64xf32>, vector<64x128xf32>, vector<8x128xf32> -> vector<8x128xf32>
    %394 = vector.broadcast %225 : vector<1x128xf32> to vector<8x128xf32>
    %395 = arith.addf %393, %394 : vector<8x128xf32>
    %396 = vector.extract_strided_slice %395 {offsets = [0, 0], sizes = [8, 96], strides = [1, 1]} : vector<8x128xf32> to vector<8x96xf32>
    %397 = arith.negf %396 : vector<8x96xf32>
    %398 = math.exp %397 : vector<8x96xf32>
    %cst_100 = arith.constant 1.000000e+00 : f32
    %399 = vector.broadcast %cst_100 : f32 to vector<8x96xf32>
    %400 = arith.addf %399, %398 : vector<8x96xf32>
    %401 = arith.divf %399, %400 : vector<8x96xf32>
    %402 = vector.extract_strided_slice %395 {offsets = [0, 96], sizes = [8, 32], strides = [1, 1]} : vector<8x128xf32> to vector<8x32xf32>
    %403 = math.tanh %402 : vector<8x32xf32>
    %404 = vector.extract_strided_slice %401 {offsets = [0, 0], sizes = [8, 32], strides = [1, 1]} : vector<8x96xf32> to vector<8x32xf32>
    %405 = vector.extract_strided_slice %401 {offsets = [0, 32], sizes = [8, 32], strides = [1, 1]} : vector<8x96xf32> to vector<8x32xf32>
    %406 = vector.extract_strided_slice %401 {offsets = [0, 64], sizes = [8, 32], strides = [1, 1]} : vector<8x96xf32> to vector<8x32xf32>
    %407 = arith.mulf %405, %386 : vector<8x32xf32>
    %408 = arith.mulf %404, %403 : vector<8x32xf32>
    %409 = arith.addf %407, %408 : vector<8x32xf32>
    %410 = math.tanh %409 : vector<8x32xf32>
    %411 = arith.mulf %406, %410 : vector<8x32xf32>
    %c8_i32_101 = arith.constant 8 : i32
    %c0_102 = arith.constant 0 : index
    %c0_103 = arith.constant 0 : index
    %412 = vector.load %arg3[%c0_102, %c0_103] : memref<8x32xf32, #tpu.memory_space<vmem>>, vector<8x32xf32>
    tpu.vector_store %arg3[%c0_102, %c0_103], %411 {strides = array<i32>} : memref<8x32xf32, #tpu.memory_space<vmem>>, vector<8x32xf32>,
    return
  }
}

</mosaic_0001>

<bundles_post_ra>
// kernel: tpu_custom_call.1
= control target key start
LH: loop header
LB: loop body
LE: loop exit
PB: predicated region body
PF: predicated region fallthrough
CT: control target
= control target key end

     0   :  { %8 = vsyncpa [#allocation4], 0  ;;  %s3091_s0 = inlined_call_operand.hbm [shape: f32[8,8,32], index: 0, kind: input, shape index: {}]   ;;  %s3092_s1 = inlined_call_operand.hbm [shape: f32[2,64,128], index: 1, kind: input, shape index: {}]   ;;  %s3093_s2 = inlined_call_operand.vmem [shape: f32[2,1,128], index: 2, kind: input, shape index: {}]   ;;  %s3094_s3 = inlined_call_operand.hbm [shape: f32[8,32], index: 3, kind: output, shape index: {}]  }
   0x1   :  { %9 = vsyncpa [#allocation7], 0 }
   0x2   :  { %10 = vsyncpa [#allocation5], 0  ;;  %s2671_s12 = smov [#allocation3]   ;;  %s2599_s16 = scalar_lea.hbm %s3091_s0, 1024 }
   0x3   :  { %s16_s13 = sshll.u32 %s2671_s12, 4  ;;  %p2600_p0 = scmp.ne.s32.totalorder %s3091_s0, %s2599_s16  ;;  %s17_s13 = int_to_ptr.vmem [resolvable:$true] %s16_s13 }
   0x4   :  { %p2603_p1 = scmp.lt.u32.totalorder %s2599_s16, %s3091_s0 }
   0x6   :  { %p2605_p2 = pnand %p2603_p1, %p2600_p0 }
   0x8   :  { %2608 = shalt.err (!%p2605_p2)
}
   0x9   :  { %s2609_s21 = scalar_lea.vmem %s17_s13, 1024  ;;  %p2614_p4 = scmp.lt.s32.totalorder %s17_s13, %s17_s13 }
   0xa   :  { %p2610_p3 = scmp.ne.s32.totalorder %s17_s13, %s2609_s21  ;;  %p2615_p5 = scmp.lt.s32.totalorder %s2609_s21, %s2609_s21 }
   0xc   :  { %p2616_p6 = por %p2615_p5, %p2614_p4 }
   0xe   :  { %p2617_p7 = pnand %p2616_p6, %p2610_p3 }
  0x10   :  { %2620 = shalt.err (!%p2617_p7)
}
  0x11   :  { %s2672_s22 = smov 128   ;;  %s2673_s23 = smov 8  }
  0x12   :  { %22 = dma.hbm_to_vmem [thread:$0]  %s3091_s0, 1024, %s17_s13, [#allocation4], %s2672_s22, %s2672_s22, %s2673_s23  }
  0x13   :  { %s2674_s26 = smov [#allocation6]   ;;  %s2621_s30 = scalar_lea.hbm %s3092_s1, 2048 }
  0x14   :  { %s28_s27 = sshll.u32 %s2674_s26, 4  ;;  %p2622_p8 = scmp.ne.s32.totalorder %s3092_s1, %s2621_s30  ;;  %s29_s27 = int_to_ptr.vmem [resolvable:$true] %s28_s27 }
  0x15   :  { %p2625_p9 = scmp.lt.u32.totalorder %s2621_s30, %s3092_s1 }
  0x17   :  { %p2627_p10 = pnand %p2625_p9, %p2622_p8 }
  0x19   :  { %2630 = shalt.err (!%p2627_p10)
}
  0x1a   :  { %s2631_s8 = scalar_lea.vmem %s29_s27, 2048  ;;  %p2636_p12 = scmp.lt.s32.totalorder %s29_s27, %s29_s27 }
  0x1b   :  { %p2632_p11 = scmp.ne.s32.totalorder %s29_s27, %s2631_s8  ;;  %p2637_p13 = scmp.lt.s32.totalorder %s2631_s8, %s2631_s8 }
  0x1d   :  { %p2638_p0 = por %p2637_p13, %p2636_p12 }
  0x1f   :  { %p2639_p1 = pnand %p2638_p0, %p2632_p11 }
  0x21   :  { %2642 = shalt.err (!%p2639_p1)
}
  0x22   :  { %34 = dma.hbm_to_vmem [thread:$0]  %s3092_s1, 2048, %s29_s27, [#allocation7], %s2672_s22, %s2672_s22, %s2673_s23  }
  0x23   :  { %2665 = dma.done.wait [#allocation4], 1024  }
  0x24   :  { %2666 = vsyncadd [#allocation4], 4294966272 }
  0x25   :  { %2667 = dma.done.wait [#allocation7], 2048  }
  0x26   :  { %2668 = vsyncadd [#allocation7], 4294965248  ;;  %v2675_v0 = vmov 0.0|0.0   ;;  %vm2676_vm0 = vmmov 0   ;;  %v2677_v1 = vmov 0.0   ;;  %v43_v2 = vld [vmem:[#allocation6] sm:$0xff] }
  0x27   :  { %2268 = vmatprep.subr.bf16.mxu0 %v2675_v0  ;;  %1980 = vmatprep.mubr.msk.f32.mxu0 %vm2676_vm0, %v2677_v1  ;;  %v44_v3 = vld [vmem:[#allocation6 + $0x8] sm:$0xff]  ;;  %v45_v4 = vld [vmem:[#allocation6 + $0x10] sm:$0xff]  ;;  %v46_v6 = vld [vmem:[#allocation6 + $0x18] sm:$0xff]  ;;  %vm53_vm1 = vcmask 261120   ;;  %vm61_vm2 = vcmask 523264   ;;  %s2678_s11 = smov 32  }
  0x28   :  { %2280 = vmatprep.subr.bf16.mxu1 %v2675_v0  ;;  %1999 = vmatprep.mubr.msk.f32.mxu1 %vm2676_vm0, %v2677_v1  ;;  %v2732_v5 = vpack.c.bf16 %v44_v3, %v43_v2  ;;  %v2735_v7 = vpack.c.bf16 %v46_v6, %v45_v4  ;;  %v47_v8 = vld [vmem:[#allocation6 + $0x20] sm:$0xff]  ;;  %v48_v9 = vld [vmem:[#allocation6 + $0x28] sm:$0xff]  ;;  %v49_v11 = vld [vmem:[#allocation6 + $0x30] sm:$0xff]  ;;  %s2679_s12 = smov 96   ;;  %s2680_s13 = smov 64  }
  0x29   :  { %v2741_v10 = vpack.c.bf16 %v48_v9, %v47_v8  ;;  %v50_v12 = vld [vmem:[#allocation6 + $0x38] sm:$0xff]  ;;  %v52_v14 = vld [vmem:[#allocation3] sm:$0xff]  ;;  %v165_v33 = vld [vmem:[#allocation3 + $0x8] sm:$0xff] }
  0x2a   :  { %2270 = vmatpush3.bf16.msra.mxu0 %v2732_v5  ;;  %2282 = vmatpush3.bf16.msra.mxu1 %v2732_v5  ;;  %v2747_v13 = vpack.c.bf16 %v50_v12, %v49_v11  ;;  %v54_v15 = vsel %vm53_vm1, %v52_v14, 0.0  ;;  %v2771_v16 = vld [vmem:[%s3093_s2] ss:$0 sm:$0xff]  ;;  %v274_v52 = vld [vmem:[#allocation3 + $0x10] sm:$0xff]  ;;  %v383_v12 = vld [vmem:[#allocation3 + $0x18] sm:$0xff] }
  0x2b   :  { %2271 = vmatprep.subr.bf16.mxu0 %v2675_v0  ;;  %2283 = vmatprep.subr.bf16.mxu1 %v2675_v0 }
  0x2e   :  { %2273 = vmatpush3.bf16.msra.mxu0 %v2735_v7  ;;  %2285 = vmatpush3.bf16.msra.mxu1 %v2735_v7 }
  0x2f   :  { %2274 = vmatprep.subr.bf16.mxu0 %v2675_v0  ;;  %2286 = vmatprep.subr.bf16.mxu1 %v2675_v0 }
  0x32   :  { %2276 = vmatpush3.bf16.msra.mxu0 %v2741_v10  ;;  %2288 = vmatpush3.bf16.msra.mxu1 %v2741_v10 }
  0x33   :  { %2277 = vmatprep.subr.bf16.mxu0 %v2675_v0  ;;  %2289 = vmatprep.subr.bf16.mxu1 %v2675_v0 }
  0x36   :  { %2279 = vmatpush3.bf16.msra.mxu0 %v2747_v13  ;;  %2291 = vmatpush3.bf16.msra.mxu1 %v2747_v13 }
  0x37   :  { %2292 = vmatprep.subr.bf16.mxu0 %v2675_v0  ;;  %2304 = vmatprep.subr.bf16.mxu1 %v2675_v0 }
  0x39   :  { %1981 = vmatmul.mubr.msk.f32.vlgmr.msra.gmra.mrb[0].mxu0 %vm61_vm2, %v54_v15 }
  0x3a   :  { %2294 = vmatpush3.bf16.msra.mxu0 %v2732_v5  ;;  %2018 = vmatprep.mubr.msk.f32.mxu0 %vm2676_vm0, %v2677_v1 }
  0x3b   :  { %2295 = vmatprep.subr.bf16.mxu0 %v2675_v0 }
  0x3e   :  { %2297 = vmatpush3.bf16.msra.mxu0 %v2735_v7 }
  0x3f   :  { %2298 = vmatprep.subr.bf16.mxu0 %v2675_v0 }
  0x42   :  { %2300 = vmatpush3.bf16.msra.mxu0 %v2741_v10 }
  0x43   :  { %2301 = vmatprep.subr.bf16.mxu0 %v2675_v0 }
  0x46   :  { %2303 = vmatpush3.bf16.msra.mxu0 %v2747_v13 }
  0x47   :  { %2316 = vmatprep.subr.bf16.mxu0 %v2675_v0 }
 0x10c   :  { %v131_v17 = vpop.f32.mrb[0].mxu0 }
 0x10d   :  { %v132_v18 = vadd.f32 %v2771_v16, %v131_v17  ;;  %v1982_v19 = vpop.f32.mrb[1].mxu0 }
 0x10f   :  { %2471 = vtanh.f32 %v132_v18  ;;  %v1787_v21 = vmul.f32 -1.442695, %v132_v18 }
 0x111   :  { %2473 = vpow2.f32 %v1787_v21 }
 0x119   :  { %v2472_v20 = vpop.eup %2471 }
 0x11a   :  { %144 = vrot.lane.b32.xlu0 %v2472_v20, %s2678_s11 }
 0x11b   :  { %v2474_v22 = vpop.eup %2473 }
 0x11c   :  { %v138_v23 = vadd.f32 1.0, %v2474_v22 }
 0x11e   :  { %2475 = vrcp.f32 %v138_v23 }
 0x128   :  { %v2476_v24 = vpop.eup %2475 }
 0x129   :  { %v142_v27 = vmul.f32 0.0, %v2476_v24 }
 0x18c   :  { %v145_v25 = vpop.permute.xlu0 %144 }
 0x18d   :  { %v147_v26 = vmul.f32 %v2476_v24, %v145_v25 }
 0x18f   :  { %149 = vrot.lane.b32.xlu0 %v147_v26, %s2678_s11 }
 0x201   :  { %v150_v28 = vpop.permute.xlu0 %149 }
 0x202   :  { %v152_v29 = vadd.f32 %v150_v28, %v142_v27 }
 0x204   :  { %2477 = vtanh.f32 %v152_v29 }
 0x20e   :  { %v2478_v30 = vpop.eup %2477 }
 0x20f   :  { %155 = vrot.lane.b32.xlu1 %v2478_v30, %s2678_s11 }
 0x281   :  { %v156_v31 = vpop.permute.xlu1 %155 }
 0x282   :  { %v2777_v32 = vmul.f32 %v2476_v24, %v156_v31 }
 0x284   :  { %166 = vrot.lane.b32.xlu1 %v2777_v32, %s2679_s12 }
 0x2f6   :  { %v167_v34 = vpop.permute.xlu1 %166 }
 0x2f7   :  { %v169_v35 = vsel %vm53_vm1, %v165_v33, %v167_v34  ;;  %v492_v34 = vld [vmem:[#allocation3 + $0x20] sm:$0xff] }
 0x2f8   :  { %2000 = vmatmul.mubr.msk.f32.vlgmr.msra.gmra.mrb[0].mxu1 %vm61_vm2, %v169_v35 }
 0x2f9   :  { %2306 = vmatpush3.bf16.msra.mxu1 %v2732_v5  ;;  %2037 = vmatprep.mubr.msk.f32.mxu1 %vm2676_vm0, %v2677_v1 }
 0x2fa   :  { %2307 = vmatprep.subr.bf16.mxu1 %v2675_v0 }
 0x2fd   :  { %2309 = vmatpush3.bf16.msra.mxu1 %v2735_v7 }
 0x2fe   :  { %2310 = vmatprep.subr.bf16.mxu1 %v2675_v0 }
 0x301   :  { %2312 = vmatpush3.bf16.msra.mxu1 %v2741_v10 }
 0x302   :  { %2313 = vmatprep.subr.bf16.mxu1 %v2675_v0 }
 0x305   :  { %2315 = vmatpush3.bf16.msra.mxu1 %v2747_v13 }
 0x306   :  { %2328 = vmatprep.subr.bf16.mxu1 %v2675_v0 }
 0x3cb   :  { %v239_v36 = vpop.f32.mrb[0].mxu1 }
 0x3cc   :  { %v240_v37 = vadd.f32 %v2771_v16, %v239_v36  ;;  %v2001_v38 = vpop.f32.mrb[1].mxu1 }
 0x3ce   :  { %2479 = vtanh.f32 %v240_v37  ;;  %v1789_v40 = vmul.f32 -1.442695, %v240_v37 }
 0x3d0   :  { %2481 = vpow2.f32 %v1789_v40 }
 0x3d8   :  { %v2480_v39 = vpop.eup %2479 }
 0x3d9   :  { %252 = vrot.lane.b32.xlu0 %v2480_v39, %s2678_s11 }
 0x3da   :  { %v2482_v41 = vpop.eup %2481 }
 0x3db   :  { %v246_v42 = vadd.f32 1.0, %v2482_v41 }
 0x3dd   :  { %2483 = vrcp.f32 %v246_v42 }
 0x3e7   :  { %v2484_v43 = vpop.eup %2483 }
 0x3e8   :  { %v250_v46 = vmul.f32 %v2484_v43, %v152_v29 }
 0x44b   :  { %v253_v44 = vpop.permute.xlu0 %252 }
 0x44c   :  { %v255_v45 = vmul.f32 %v2484_v43, %v253_v44 }
 0x44e   :  { %257 = vrot.lane.b32.xlu1 %v255_v45, %s2678_s11 }
 0x4c0   :  { %v258_v47 = vpop.permute.xlu1 %257 }
 0x4c1   :  { %v260_v48 = vadd.f32 %v258_v47, %v250_v46 }
 0x4c3   :  { %2485 = vtanh.f32 %v260_v48 }
 0x4cd   :  { %v2486_v49 = vpop.eup %2485 }
 0x4ce   :  { %263 = vrot.lane.b32.xlu0 %v2486_v49, %s2678_s11 }
 0x540   :  { %v264_v50 = vpop.permute.xlu0 %263 }
 0x541   :  { %v2797_v51 = vmul.f32 %v2484_v43, %v264_v50 }
 0x543   :  { %275 = vrot.lane.b32.xlu1 %v2797_v51, %s2679_s12 }
 0x5b5   :  { %v276_v53 = vpop.permute.xlu1 %275 }
 0x5b6   :  { %v278_v54 = vsel %vm53_vm1, %v274_v52, %v276_v53 }
 0x5b7   :  { %2019 = vmatmul.mubr.msk.f32.vlgmr.msra.gmra.mrb[2].mxu0 %vm61_vm2, %v278_v54  ;;  %v601_v54 = vld [vmem:[#allocation3 + $0x28] sm:$0xff] }
 0x5b8   :  { %2318 = vmatpush3.bf16.msra.mxu0 %v2732_v5  ;;  %2056 = vmatprep.mubr.msk.f32.mxu0 %vm2676_vm0, %v2677_v1 }
 0x5b9   :  { %2319 = vmatprep.subr.bf16.mxu0 %v2675_v0 }
 0x5bc   :  { %2321 = vmatpush3.bf16.msra.mxu0 %v2735_v7 }
 0x5bd   :  { %2322 = vmatprep.subr.bf16.mxu0 %v2675_v0 }
 0x5c0   :  { %2324 = vmatpush3.bf16.msra.mxu0 %v2741_v10 }
 0x5c1   :  { %2325 = vmatprep.subr.bf16.mxu0 %v2675_v0 }
 0x5c4   :  { %2327 = vmatpush3.bf16.msra.mxu0 %v2747_v13 }
 0x5c5   :  { %2340 = vmatprep.subr.bf16.mxu0 %v2675_v0 }
 0x68a   :  { %v348_v55 = vpop.f32.mrb[2].mxu0 }
 0x68b   :  { %v349_v56 = vadd.f32 %v2771_v16, %v348_v55  ;;  %v2020_v57 = vpop.f32.mrb[3].mxu0 }
 0x68d   :  { %2487 = vtanh.f32 %v349_v56  ;;  %v1791_v59 = vmul.f32 -1.442695, %v349_v56 }
 0x68f   :  { %2489 = vpow2.f32 %v1791_v59 }
 0x697   :  { %v2488_v58 = vpop.eup %2487 }
 0x698   :  { %361 = vrot.lane.b32.xlu0 %v2488_v58, %s2678_s11 }
 0x699   :  { %v2490_v60 = vpop.eup %2489 }
 0x69a   :  { %v355_v61 = vadd.f32 1.0, %v2490_v60 }
 0x69c   :  { %2491 = vrcp.f32 %v355_v61 }
 0x6a6   :  { %v2492_v62 = vpop.eup %2491 }
 0x6a7   :  { %v359_v3 = vmul.f32 %v2492_v62, %v260_v48 }
 0x70a   :  { %v362_v63 = vpop.permute.xlu0 %361 }
 0x70b   :  { %v364_v2 = vmul.f32 %v2492_v62, %v362_v63 }
 0x70d   :  { %366 = vrot.lane.b32.xlu1 %v364_v2, %s2678_s11 }
 0x77f   :  { %v367_v4 = vpop.permute.xlu1 %366 }
 0x780   :  { %v369_v6 = vadd.f32 %v367_v4, %v359_v3 }
 0x782   :  { %2493 = vtanh.f32 %v369_v6 }
 0x78c   :  { %v2494_v8 = vpop.eup %2493 }
 0x78d   :  { %372 = vrot.lane.b32.xlu0 %v2494_v8, %s2678_s11 }
 0x7ff   :  { %v373_v9 = vpop.permute.xlu0 %372 }
 0x800   :  { %v2817_v11 = vmul.f32 %v2492_v62, %v373_v9 }
 0x802   :  { %384 = vrot.lane.b32.xlu1 %v2817_v11, %s2679_s12 }
 0x874   :  { %v385_v14 = vpop.permute.xlu1 %384 }
 0x875   :  { %v387_v15 = vsel %vm53_vm1, %v383_v12, %v385_v14  ;;  %v928_v12 = vld [vmem:[#allocation6 + $0x40] sm:$0xff]  ;;  %v929_v14 = vld [vmem:[#allocation6 + $0x48] sm:$0xff] }
 0x876   :  { %2038 = vmatmul.mubr.msk.f32.vlgmr.msra.gmra.mrb[2].mxu1 %vm61_vm2, %v387_v15  ;;  %v710_v15 = vld [vmem:[#allocation3 + $0x30] sm:$0xff] }
 0x877   :  { %2330 = vmatpush3.bf16.msra.mxu1 %v2732_v5  ;;  %2075 = vmatprep.mubr.msk.f32.mxu1 %vm2676_vm0, %v2677_v1 }
 0x878   :  { %2331 = vmatprep.subr.bf16.mxu1 %v2675_v0 }
 0x87b   :  { %2333 = vmatpush3.bf16.msra.mxu1 %v2735_v7 }
 0x87c   :  { %2334 = vmatprep.subr.bf16.mxu1 %v2675_v0 }
 0x87f   :  { %2336 = vmatpush3.bf16.msra.mxu1 %v2741_v10 }
 0x880   :  { %2337 = vmatprep.subr.bf16.mxu1 %v2675_v0 }
 0x883   :  { %2339 = vmatpush3.bf16.msra.mxu1 %v2747_v13 }
 0x884   :  { %2352 = vmatprep.subr.bf16.mxu1 %v2675_v0 }
 0x949   :  { %v457_v17 = vpop.f32.mrb[2].mxu1 }
 0x94a   :  { %v458_v18 = vadd.f32 %v2771_v16, %v457_v17  ;;  %v2039_v19 = vpop.f32.mrb[3].mxu1  ;;  %v2887_v17 = vpack.c.bf16 %v929_v14, %v928_v12 }
 0x94b   :  { %v930_v19 = vld [vmem:[#allocation6 + $0x50] sm:$0xff] }
 0x94c   :  { %2495 = vtanh.f32 %v458_v18  ;;  %v1793_v21 = vmul.f32 -1.442695, %v458_v18 }
 0x94e   :  { %2497 = vpow2.f32 %v1793_v21 }
 0x956   :  { %v2496_v20 = vpop.eup %2495 }
 0x957   :  { %470 = vrot.lane.b32.xlu0 %v2496_v20, %s2678_s11  ;;  %v931_v20 = vld [vmem:[#allocation6 + $0x58] sm:$0xff] }
 0x958   :  { %v2498_v22 = vpop.eup %2497 }
 0x959   :  { %v464_v23 = vadd.f32 1.0, %v2498_v22  ;;  %v932_v22 = vld [vmem:[#allocation6 + $0x60] sm:$0xff] }
 0x95b   :  { %2499 = vrcp.f32 %v464_v23  ;;  %v933_v23 = vld [vmem:[#allocation6 + $0x68] sm:$0xff] }
 0x965   :  { %v2500_v24 = vpop.eup %2499 }
 0x966   :  { %v468_v27 = vmul.f32 %v2500_v24, %v369_v6 }
 0x9c9   :  { %v471_v25 = vpop.permute.xlu0 %470 }
 0x9ca   :  { %v473_v26 = vmul.f32 %v2500_v24, %v471_v25  ;;  %v934_v25 = vld [vmem:[#allocation6 + $0x70] sm:$0xff] }
 0x9cc   :  { %475 = vrot.lane.b32.xlu1 %v473_v26, %s2678_s11  ;;  %v935_v26 = vld [vmem:[#allocation6 + $0x78] sm:$0xff] }
 0xa3e   :  { %v476_v28 = vpop.permute.xlu1 %475 }
 0xa3f   :  { %v478_v29 = vadd.f32 %v476_v28, %v468_v27  ;;  %v2902_v27 = vpack.c.bf16 %v935_v26, %v934_v25 }
 0xa41   :  { %2501 = vtanh.f32 %v478_v29 }
 0xa4b   :  { %v2502_v30 = vpop.eup %2501 }
 0xa4c   :  { %481 = vrot.lane.b32.xlu0 %v2502_v30, %s2678_s11 }
 0xabe   :  { %v482_v31 = vpop.permute.xlu0 %481 }
 0xabf   :  { %v2837_v33 = vmul.f32 %v2500_v24, %v482_v31  ;;  %v2898_v24 = vpack.c.bf16 %v933_v23, %v932_v22 }
 0xac1   :  { %493 = vrot.lane.b32.xlu1 %v2837_v33, %s2679_s12 }
 0xb33   :  { %v494_v35 = vpop.permute.xlu1 %493 }
 0xb34   :  { %v496_v36 = vsel %vm53_vm1, %v492_v34, %v494_v35 }
 0xb35   :  { %2057 = vmatmul.mubr.msk.f32.vlgmr.msra.gmra.mrb[4].mxu0 %vm61_vm2, %v496_v36  ;;  %v2924_v36 = vld [vmem:[%s3093_s2 + $0x1] ss:$0 sm:$0xff]  ;;  %s2681_s2 = smov [#allocation8]  }
 0xb36   :  { %2342 = vmatpush3.bf16.msra.mxu0 %v2732_v5  ;;  %2094 = vmatprep.mubr.msk.f32.mxu0 %vm2676_vm0, %v2677_v1  ;;  %s1775_s16 = sshll.u32 %s2681_s2, 4  ;;  %s1776_s16 = int_to_ptr.vmem [resolvable:$true] %s1775_s16 }
 0xb37   :  { %2343 = vmatprep.subr.bf16.mxu0 %v2675_v0  ;;  %s2643_s17 = scalar_lea.vmem %s1776_s16, 128  ;;  %p2648_p3 = scmp.lt.s32.totalorder %s1776_s16, %s1776_s16 }
 0xb38   :  { %p2644_p2 = scmp.ne.s32.totalorder %s1776_s16, %s2643_s17  ;;  %p2649_p4 = scmp.lt.s32.totalorder %s2643_s17, %s2643_s17 }
 0xb3a   :  { %2345 = vmatpush3.bf16.msra.mxu0 %v2735_v7  ;;  %p2650_p5 = por %p2649_p4, %p2648_p3 }
 0xb3b   :  { %2346 = vmatprep.subr.bf16.mxu0 %v2675_v0 }
 0xb3c   :  { %p2651_p6 = pnand %p2650_p5, %p2644_p2 }
 0xb3e   :  { %2348 = vmatpush3.bf16.msra.mxu0 %v2741_v10 }
 0xb3f   :  { %2349 = vmatprep.subr.bf16.mxu0 %v2675_v0 }
 0xb42   :  { %2351 = vmatpush3.bf16.msra.mxu0 %v2747_v13 }
 0xb43   :  { %2364 = vmatprep.subr.bf16.mxu0 %v2675_v0 }
 0xc08   :  { %v566_v37 = vpop.f32.mrb[4].mxu0 }
 0xc09   :  { %v567_v38 = vadd.f32 %v2771_v16, %v566_v37  ;;  %v2058_v39 = vpop.f32.mrb[5].mxu0 }
 0xc0b   :  { %2503 = vtanh.f32 %v567_v38  ;;  %v1795_v41 = vmul.f32 -1.442695, %v567_v38 }
 0xc0d   :  { %2505 = vpow2.f32 %v1795_v41 }
 0xc15   :  { %v2504_v40 = vpop.eup %2503 }
 0xc16   :  { %579 = vrot.lane.b32.xlu0 %v2504_v40, %s2678_s11 }
 0xc17   :  { %v2506_v42 = vpop.eup %2505 }
 0xc18   :  { %v573_v43 = vadd.f32 1.0, %v2506_v42 }
 0xc1a   :  { %2507 = vrcp.f32 %v573_v43 }
 0xc24   :  { %v2508_v44 = vpop.eup %2507 }
 0xc25   :  { %v577_v47 = vmul.f32 %v2508_v44, %v478_v29 }
 0xc88   :  { %v580_v45 = vpop.permute.xlu0 %579 }
 0xc89   :  { %v582_v46 = vmul.f32 %v2508_v44, %v580_v45 }
 0xc8b   :  { %584 = vrot.lane.b32.xlu1 %v582_v46, %s2678_s11 }
 0xcfd   :  { %v585_v48 = vpop.permute.xlu1 %584 }
 0xcfe   :  { %v587_v49 = vadd.f32 %v585_v48, %v577_v47 }
 0xd00   :  { %2509 = vtanh.f32 %v587_v49 }
 0xd0a   :  { %v2510_v50 = vpop.eup %2509 }
 0xd0b   :  { %590 = vrot.lane.b32.xlu0 %v2510_v50, %s2678_s11 }
 0xd7d   :  { %v591_v52 = vpop.permute.xlu0 %590 }
 0xd7e   :  { %v2857_v53 = vmul.f32 %v2508_v44, %v591_v52 }
 0xd80   :  { %602 = vrot.lane.b32.xlu1 %v2857_v53, %s2679_s12 }
 0xdf2   :  { %v603_v55 = vpop.permute.xlu1 %602 }
 0xdf3   :  { %v605_v56 = vsel %vm53_vm1, %v601_v54, %v603_v55 }
 0xdf4   :  { %2076 = vmatmul.mubr.msk.f32.vlgmr.msra.gmra.mrb[4].mxu1 %vm61_vm2, %v605_v56 }
 0xdf5   :  { %2354 = vmatpush3.bf16.msra.mxu1 %v2732_v5  ;;  %2113 = vmatprep.mubr.msk.f32.mxu1 %vm2676_vm0, %v2677_v1 }
 0xdf6   :  { %2355 = vmatprep.subr.bf16.mxu1 %v2675_v0 }
 0xdf9   :  { %2357 = vmatpush3.bf16.msra.mxu1 %v2735_v7 }
 0xdfa   :  { %2358 = vmatprep.subr.bf16.mxu1 %v2675_v0 }
 0xdfd   :  { %2360 = vmatpush3.bf16.msra.mxu1 %v2741_v10 }
 0xdfe   :  { %2361 = vmatprep.subr.bf16.mxu1 %v2675_v0 }
 0xe01   :  { %2363 = vmatpush3.bf16.msra.mxu1 %v2747_v13 }
 0xe02   :  { %2376 = vmatprep.subr.bf16.mxu1 %v2675_v0 }
 0xec7   :  { %v675_v57 = vpop.f32.mrb[4].mxu1 }
 0xec8   :  { %v676_v5 = vadd.f32 %v2771_v16, %v675_v57  ;;  %v2077_v58 = vpop.f32.mrb[5].mxu1 }
 0xeca   :  { %2511 = vtanh.f32 %v676_v5  ;;  %v1797_v60 = vmul.f32 -1.442695, %v676_v5 }
 0xecc   :  { %2513 = vpow2.f32 %v1797_v60 }
 0xed4   :  { %v2512_v59 = vpop.eup %2511 }
 0xed5   :  { %688 = vrot.lane.b32.xlu0 %v2512_v59, %s2678_s11 }
 0xed6   :  { %v2514_v7 = vpop.eup %2513 }
 0xed7   :  { %v682_v61 = vadd.f32 1.0, %v2514_v7 }
 0xed9   :  { %2515 = vrcp.f32 %v682_v61 }
 0xee3   :  { %v2516_v10 = vpop.eup %2515 }
 0xee4   :  { %v686_v13 = vmul.f32 %v2516_v10, %v587_v49 }
 0xf47   :  { %v689_v62 = vpop.permute.xlu0 %688 }
 0xf48   :  { %v691_v63 = vmul.f32 %v2516_v10, %v689_v62 }
 0xf4a   :  { %693 = vrot.lane.b32.xlu1 %v691_v63, %s2678_s11 }
 0xfbc   :  { %v694_v2 = vpop.permute.xlu1 %693 }
 0xfbd   :  { %v2876_v3 = vadd.f32 %v694_v2, %v686_v13  ;;  %v819_v2 = vld [vmem:[#allocation3 + $0x38] sm:$0xff] }
 0xfbf   :  { %2517 = vtanh.f32 %v2876_v3 }
 0xfc9   :  { %v2518_v4 = vpop.eup %2517 }
 0xfca   :  { %699 = vrot.lane.b32.xlu0 %v2518_v4, %s2678_s11 }
 0xfce   :  { %160 = vrot.lane.b32.xlu0 %v2777_v32, %s2680_s13  ;;  %v2892_v32 = vpack.c.bf16 %v931_v20, %v930_v19 }
0x103c   :  { %v700_v6 = vpop.permute.xlu0 %699 }
0x103d   :  { %v2882_v8 = vmul.f32 %v2516_v10, %v700_v6 }
0x103f   :  { %711 = vrot.lane.b32.xlu1 %v2882_v8, %s2679_s12 }
0x1040   :  { %v161_v9 = vpop.permute.xlu0 %160 }
0x1041   :  { %163 = vst.msk [vmem:[#allocation2] sm:$0xff] %vm53_vm1, %v161_v9 }
0x1048   :  { %v938_v28 = vld [vmem:[#allocation2] sm:$0xff] }
0x1049   :  { %v939_v29 = vsel %vm53_vm1, %v938_v28, 0.0 }
0x10b1   :  { %v712_v18 = vpop.permute.xlu1 %711 }
0x10b2   :  { %v714_v21 = vsel %vm53_vm1, %v710_v15, %v712_v18 }
0x10b3   :  { %2095 = vmatmul.mubr.msk.f32.vlgmr.msra.gmra.mrb[6].mxu0 %vm61_vm2, %v714_v21 }
0x10b4   :  { %2366 = vmatpush3.bf16.msra.mxu0 %v2887_v17  ;;  %2132 = vmatprep.mubr.msk.f32.mxu0 %vm2676_vm0, %v2677_v1 }
0x10b5   :  { %2367 = vmatprep.subr.bf16.mxu0 %v2675_v0 }
0x10b8   :  { %2369 = vmatpush3.bf16.msra.mxu0 %v2892_v32 }
0x10b9   :  { %2370 = vmatprep.subr.bf16.mxu0 %v2675_v0 }
0x10bc   :  { %2372 = vmatpush3.bf16.msra.mxu0 %v2898_v24 }
0x10bd   :  { %2373 = vmatprep.subr.bf16.mxu0 %v2675_v0 }
0x10c0   :  { %2375 = vmatpush3.bf16.msra.mxu0 %v2902_v27 }
0x10c1   :  { %2388 = vmatprep.subr.bf16.mxu0 %v2675_v0 }
0x10c3   :  { %2133 = vmatmul.mubr.msk.f32.vlgmr.msra.gmra.mrb[8].mxu0 %vm61_vm2, %v939_v29 }
0x10c4   :  { %2390 = vmatpush3.bf16.msra.mxu0 %v2887_v17  ;;  %2170 = vmatprep.mubr.msk.f32.mxu0 %vm2676_vm0, %v2677_v1 }
0x10c5   :  { %2391 = vmatprep.subr.bf16.mxu0 %v2675_v0 }
0x10c8   :  { %2393 = vmatpush3.bf16.msra.mxu0 %v2892_v32 }
0x10c9   :  { %2394 = vmatprep.subr.bf16.mxu0 %v2675_v0 }
0x10cc   :  { %2396 = vmatpush3.bf16.msra.mxu0 %v2898_v24 }
0x10cd   :  { %2397 = vmatprep.subr.bf16.mxu0 %v2675_v0 }
0x10d0   :  { %2399 = vmatpush3.bf16.msra.mxu0 %v2902_v27 }
0x10d1   :  { %2412 = vmatprep.subr.bf16.mxu0 %v2675_v0 }
0x1186   :  { %v784_v30 = vpop.f32.mrb[6].mxu0 }
0x1187   :  { %v785_v31 = vadd.f32 %v2771_v16, %v784_v30  ;;  %v2096_v34 = vpop.f32.mrb[7].mxu0 }
0x1189   :  { %2519 = vtanh.f32 %v785_v31  ;;  %v1799_v41 = vmul.f32 -1.442695, %v785_v31 }
0x1193   :  { %v2520_v35 = vpop.eup %2519 }
0x1194   :  { %797 = vrot.lane.b32.xlu1 %v2520_v35, %s2678_s11 }
0x1196   :  { %v1015_v37 = vpop.f32.mrb[8].mxu0 }
0x1197   :  { %v1016_v38 = vadd.f32 %v2924_v36, %v1015_v37  ;;  %v2134_v39 = vpop.f32.mrb[9].mxu0 }
0x1199   :  { %2521 = vtanh.f32 %v1016_v38  ;;  %v1805_v43 = vmul.f32 -1.442695, %v1016_v38 }
0x119a   :  { %2523 = vpow2.f32 %v1799_v41 }
0x119b   :  { %2525 = vpow2.f32 %v1805_v43 }
0x11a3   :  { %v2522_v40 = vpop.eup %2521 }
0x11a4   :  { %1028 = vrot.lane.b32.xlu0 %v2522_v40, %s2678_s11  ;;  %v2524_v42 = vpop.eup %2523 }
0x11a5   :  { %v791_v44 = vadd.f32 1.0, %v2524_v42  ;;  %v2526_v45 = vpop.eup %2525 }
0x11a6   :  { %v1022_v49 = vadd.f32 1.0, %v2526_v45 }
0x11a7   :  { %2527 = vrcp.f32 %v791_v44 }
0x11a8   :  { %2529 = vrcp.f32 %v1022_v49 }
0x11b1   :  { %v2528_v46 = vpop.eup %2527 }
0x11b2   :  { %v2530_v50 = vpop.eup %2529  ;;  %v795_v55 = vmul.f32 %v2528_v46, %v2876_v3 }
0x11b3   :  { %v1026_v58 = vmul.f32 0.0, %v2530_v50 }
0x1206   :  { %v798_v47 = vpop.permute.xlu1 %797 }
0x1207   :  { %v800_v48 = vmul.f32 %v2528_v46, %v798_v47 }
0x1209   :  { %802 = vrot.lane.b32.xlu1 %v800_v48, %s2678_s11 }
0x1216   :  { %v1029_v52 = vpop.permute.xlu0 %1028 }
0x1217   :  { %v1031_v54 = vmul.f32 %v2530_v50, %v1029_v52 }
0x1219   :  { %1033 = vrot.lane.b32.xlu0 %v1031_v54, %s2678_s11 }
0x127b   :  { %v803_v56 = vpop.permute.xlu1 %802 }
0x127c   :  { %v2931_v57 = vadd.f32 %v803_v56, %v795_v55 }
0x127e   :  { %2531 = vtanh.f32 %v2931_v57 }
0x1288   :  { %v2532_v5 = vpop.eup %2531 }
0x1289   :  { %808 = vrot.lane.b32.xlu1 %v2532_v5, %s2678_s11 }
0x128b   :  { %v1034_v59 = vpop.permute.xlu0 %1033 }
0x128c   :  { %v1036_v60 = vadd.f32 %v1034_v59, %v1026_v58 }
0x128e   :  { %2533 = vtanh.f32 %v1036_v60 }
0x1298   :  { %v2534_v7 = vpop.eup %2533 }
0x1299   :  { %1039 = vrot.lane.b32.xlu0 %v2534_v7, %s2678_s11 }
0x129d   :  { %268 = vrot.lane.b32.xlu0 %v2797_v51, %s2680_s13 }
0x12fb   :  { %v809_v61 = vpop.permute.xlu1 %808 }
0x12fc   :  { %v2938_v10 = vmul.f32 %v2528_v46, %v809_v61 }
0x12fe   :  { %820 = vrot.lane.b32.xlu1 %v2938_v10, %s2679_s12 }
0x130b   :  { %v1040_v62 = vpop.permute.xlu0 %1039 }
0x130c   :  { %v1042_v63 = vmul.f32 %v2530_v50, %v1040_v62 }
0x130e   :  { %1045 = vrot.lane.b32.xlu1 %v1042_v63, %s2679_s12 }
0x130f   :  { %v269_v13 = vpop.permute.xlu0 %268 }
0x1310   :  { %272 = vst.msk [vmem:[#allocation2 + $0x8] sm:$0xff] %vm53_vm1, %v269_v13 }
0x1317   :  { %v1043_v6 = vld [vmem:[#allocation2 + $0x8] sm:$0xff] }
0x1370   :  { %v821_v3 = vpop.permute.xlu1 %820 }
0x1371   :  { %v823_v4 = vsel %vm53_vm1, %v819_v2, %v821_v3 }
0x1372   :  { %2114 = vmatmul.mubr.msk.f32.vlgmr.msra.gmra.mrb[6].mxu1 %vm61_vm2, %v823_v4 }
0x1373   :  { %2378 = vmatpush3.bf16.msra.mxu1 %v2887_v17  ;;  %2151 = vmatprep.mubr.msk.f32.mxu1 %vm2676_vm0, %v2677_v1 }
0x1374   :  { %2379 = vmatprep.subr.bf16.mxu1 %v2675_v0 }
0x1377   :  { %2381 = vmatpush3.bf16.msra.mxu1 %v2892_v32 }
0x1378   :  { %2382 = vmatprep.subr.bf16.mxu1 %v2675_v0 }
0x137b   :  { %2384 = vmatpush3.bf16.msra.mxu1 %v2898_v24 }
0x137c   :  { %2385 = vmatprep.subr.bf16.mxu1 %v2675_v0 }
0x137f   :  { %2387 = vmatpush3.bf16.msra.mxu1 %v2902_v27 }
0x1380   :  { %v1046_v51 = vpop.permute.xlu1 %1045  ;;  %2400 = vmatprep.subr.bf16.mxu1 %v2675_v0 }
0x1381   :  { %v1048_v9 = vsel %vm53_vm1, %v1043_v6, %v1046_v51 }
0x1382   :  { %2152 = vmatmul.mubr.msk.f32.vlgmr.msra.gmra.mrb[8].mxu1 %vm61_vm2, %v1048_v9 }
0x1383   :  { %2402 = vmatpush3.bf16.msra.mxu1 %v2887_v17  ;;  %2189 = vmatprep.mubr.msk.f32.mxu1 %vm2676_vm0, %v2677_v1 }
0x1384   :  { %2403 = vmatprep.subr.bf16.mxu1 %v2675_v0 }
0x1387   :  { %2405 = vmatpush3.bf16.msra.mxu1 %v2892_v32 }
0x1388   :  { %2406 = vmatprep.subr.bf16.mxu1 %v2675_v0 }
0x138b   :  { %2408 = vmatpush3.bf16.msra.mxu1 %v2898_v24 }
0x138c   :  { %2409 = vmatprep.subr.bf16.mxu1 %v2675_v0 }
0x138f   :  { %2411 = vmatpush3.bf16.msra.mxu1 %v2902_v27 }
0x1390   :  { %2424 = vmatprep.subr.bf16.mxu1 %v2675_v0 }
0x1445   :  { %v2968_v12 = vpop.f32.mrb[6].mxu1 }
0x1446   :  { %v2115_v14 = vpop.f32.mrb[7].mxu1 }
0x1455   :  { %v1118_v15 = vpop.f32.mrb[8].mxu1 }
0x1456   :  { %v1119_v18 = vadd.f32 %v2924_v36, %v1118_v15  ;;  %v2153_v19 = vpop.f32.mrb[9].mxu1 }
0x1458   :  { %2535 = vtanh.f32 %v1119_v18  ;;  %v1807_v21 = vmul.f32 -1.442695, %v1119_v18 }
0x145a   :  { %2537 = vpow2.f32 %v1807_v21 }
0x1462   :  { %v2536_v20 = vpop.eup %2535 }
0x1463   :  { %1131 = vrot.lane.b32.xlu0 %v2536_v20, %s2678_s11 }
0x1464   :  { %v2538_v22 = vpop.eup %2537 }
0x1465   :  { %v1125_v23 = vadd.f32 1.0, %v2538_v22 }
0x1467   :  { %2539 = vrcp.f32 %v1125_v23 }
0x1471   :  { %v2540_v25 = vpop.eup %2539 }
0x1472   :  { %v1129_v29 = vmul.f32 %v2540_v25, %v1036_v60 }
0x14d5   :  { %v1132_v26 = vpop.permute.xlu0 %1131 }
0x14d6   :  { %v1134_v28 = vmul.f32 %v2540_v25, %v1132_v26 }
0x14d8   :  { %1136 = vrot.lane.b32.xlu1 %v1134_v28, %s2678_s11 }
0x14dc   :  { %377 = vrot.lane.b32.xlu1 %v2817_v11, %s2680_s13 }
0x154a   :  { %v1137_v30 = vpop.permute.xlu1 %1136 }
0x154b   :  { %v1139_v31 = vadd.f32 %v1137_v30, %v1129_v29 }
0x154d   :  { %2541 = vtanh.f32 %v1139_v31 }
0x154e   :  { %v378_v34 = vpop.permute.xlu1 %377 }
0x154f   :  { %381 = vst.msk [vmem:[#allocation2 + $0x10] sm:$0xff] %vm53_vm1, %v378_v34 }
0x1556   :  { %v1146_v39 = vld [vmem:[#allocation2 + $0x10] sm:$0xff] }
0x1557   :  { %v2542_v35 = vpop.eup %2541 }
0x1558   :  { %1142 = vrot.lane.b32.xlu0 %v2542_v35, %s2678_s11 }
0x15ca   :  { %v1143_v37 = vpop.permute.xlu0 %1142 }
0x15cb   :  { %v1145_v38 = vmul.f32 %v2540_v25, %v1143_v37 }
0x15cd   :  { %1148 = vrot.lane.b32.xlu0 %v1145_v38, %s2679_s12 }
0x163f   :  { %v1149_v40 = vpop.permute.xlu0 %1148 }
0x1640   :  { %v1151_v41 = vsel %vm53_vm1, %v1146_v39, %v1149_v40 }
0x1641   :  { %2171 = vmatmul.mubr.msk.f32.vlgmr.msra.gmra.mrb[10].mxu0 %vm61_vm2, %v1151_v41 }
0x1642   :  { %2414 = vmatpush3.bf16.msra.mxu0 %v2887_v17  ;;  %2208 = vmatprep.mubr.msk.f32.mxu0 %vm2676_vm0, %v2677_v1 }
0x1643   :  { %2415 = vmatprep.subr.bf16.mxu0 %v2675_v0 }
0x1646   :  { %2417 = vmatpush3.bf16.msra.mxu0 %v2892_v32 }
0x1647   :  { %2418 = vmatprep.subr.bf16.mxu0 %v2675_v0 }
0x164a   :  { %2420 = vmatpush3.bf16.msra.mxu0 %v2898_v24 }
0x164b   :  { %2421 = vmatprep.subr.bf16.mxu0 %v2675_v0 }
0x164e   :  { %2423 = vmatpush3.bf16.msra.mxu0 %v2902_v27 }
0x164f   :  { %2436 = vmatprep.subr.bf16.mxu0 %v2675_v0 }
0x1714   :  { %v1221_v11 = vpop.f32.mrb[10].mxu0 }
0x1715   :  { %v1222_v42 = vadd.f32 %v2924_v36, %v1221_v11  ;;  %v2172_v43 = vpop.f32.mrb[11].mxu0 }
0x1717   :  { %2543 = vtanh.f32 %v1222_v42  ;;  %v1809_v45 = vmul.f32 -1.442695, %v1222_v42 }
0x1719   :  { %2545 = vpow2.f32 %v1809_v45 }
0x1721   :  { %v2544_v44 = vpop.eup %2543 }
0x1722   :  { %1234 = vrot.lane.b32.xlu1 %v2544_v44, %s2678_s11 }
0x1723   :  { %v2546_v46 = vpop.eup %2545 }
0x1724   :  { %v1228_v47 = vadd.f32 1.0, %v2546_v46 }
0x1726   :  { %2547 = vrcp.f32 %v1228_v47 }
0x1730   :  { %v2548_v48 = vpop.eup %2547 }
0x1731   :  { %v1232_v52 = vmul.f32 %v2548_v48, %v1139_v31 }
0x1794   :  { %v1235_v49 = vpop.permute.xlu1 %1234 }
0x1795   :  { %v1237_v50 = vmul.f32 %v2548_v48, %v1235_v49 }
0x1797   :  { %1239 = vrot.lane.b32.xlu0 %v1237_v50, %s2678_s11 }
0x179b   :  { %486 = vrot.lane.b32.xlu0 %v2837_v33, %s2680_s13 }
0x1809   :  { %v1240_v54 = vpop.permute.xlu0 %1239 }
0x180a   :  { %v1242_v55 = vadd.f32 %v1240_v54, %v1232_v52 }
0x180c   :  { %2549 = vtanh.f32 %v1242_v55 }
0x180d   :  { %v487_v56 = vpop.permute.xlu0 %486 }
0x180e   :  { %490 = vst.msk [vmem:[#allocation2 + $0x18] sm:$0xff] %vm53_vm1, %v487_v56 }
0x1815   :  { %v1249_v60 = vld [vmem:[#allocation2 + $0x18] sm:$0xff] }
0x1816   :  { %v2550_v5 = vpop.eup %2549 }
0x1817   :  { %1245 = vrot.lane.b32.xlu1 %v2550_v5, %s2678_s11 }
0x1889   :  { %v1246_v58 = vpop.permute.xlu1 %1245 }
0x188a   :  { %v1248_v59 = vmul.f32 %v2548_v48, %v1246_v58 }
0x188c   :  { %1251 = vrot.lane.b32.xlu1 %v1248_v59, %s2679_s12 }
0x18fe   :  { %v1252_v7 = vpop.permute.xlu1 %1251 }
0x18ff   :  { %v1254_v61 = vsel %vm53_vm1, %v1249_v60, %v1252_v7 }
0x1900   :  { %2190 = vmatmul.mubr.msk.f32.vlgmr.msra.gmra.mrb[10].mxu1 %vm61_vm2, %v1254_v61 }
0x1901   :  { %2426 = vmatpush3.bf16.msra.mxu1 %v2887_v17  ;;  %2227 = vmatprep.mubr.msk.f32.mxu1 %vm2676_vm0, %v2677_v1 }
0x1902   :  { %2427 = vmatprep.subr.bf16.mxu1 %v2675_v0 }
0x1905   :  { %2429 = vmatpush3.bf16.msra.mxu1 %v2892_v32 }
0x1906   :  { %2430 = vmatprep.subr.bf16.mxu1 %v2675_v0 }
0x1909   :  { %2432 = vmatpush3.bf16.msra.mxu1 %v2898_v24 }
0x190a   :  { %2433 = vmatprep.subr.bf16.mxu1 %v2675_v0 }
0x190d   :  { %2435 = vmatpush3.bf16.msra.mxu1 %v2902_v27 }
0x190e   :  { %2448 = vmatprep.subr.bf16.mxu1 %v2675_v0 }
0x19d3   :  { %v1324_v33 = vpop.f32.mrb[10].mxu1 }
0x19d4   :  { %v1325_v62 = vadd.f32 %v2924_v36, %v1324_v33  ;;  %v2191_v63 = vpop.f32.mrb[11].mxu1 }
0x19d6   :  { %2551 = vtanh.f32 %v1325_v62  ;;  %v1811_v2 = vmul.f32 -1.442695, %v1325_v62 }
0x19d8   :  { %2553 = vpow2.f32 %v1811_v2 }
0x19e0   :  { %v2552_v13 = vpop.eup %2551 }
0x19e1   :  { %1337 = vrot.lane.b32.xlu0 %v2552_v13, %s2678_s11 }
0x19e2   :  { %v2554_v3 = vpop.eup %2553 }
0x19e3   :  { %v1331_v4 = vadd.f32 1.0, %v2554_v3 }
0x19e5   :  { %2555 = vrcp.f32 %v1331_v4 }
0x19ef   :  { %v2556_v51 = vpop.eup %2555 }
0x19f0   :  { %v1335_v14 = vmul.f32 %v2556_v51, %v1242_v55 }
0x1a53   :  { %v1338_v6 = vpop.permute.xlu0 %1337 }
0x1a54   :  { %v1340_v9 = vmul.f32 %v2556_v51, %v1338_v6 }
0x1a56   :  { %1342 = vrot.lane.b32.xlu1 %v1340_v9, %s2678_s11 }
0x1a5a   :  { %595 = vrot.lane.b32.xlu1 %v2857_v53, %s2680_s13 }
0x1ac8   :  { %v1343_v15 = vpop.permute.xlu1 %1342 }
0x1ac9   :  { %v1345_v18 = vadd.f32 %v1343_v15, %v1335_v14 }
0x1acb   :  { %2557 = vtanh.f32 %v1345_v18 }
0x1acc   :  { %v596_v19 = vpop.permute.xlu1 %595 }
0x1acd   :  { %599 = vst.msk [vmem:[#allocation2 + $0x20] sm:$0xff] %vm53_vm1, %v596_v19 }
0x1ad4   :  { %v1352_v23 = vld [vmem:[#allocation2 + $0x20] sm:$0xff] }
0x1ad5   :  { %v2558_v20 = vpop.eup %2557 }
0x1ad6   :  { %1348 = vrot.lane.b32.xlu0 %v2558_v20, %s2678_s11 }
0x1b48   :  { %v1349_v21 = vpop.permute.xlu0 %1348 }
0x1b49   :  { %v1351_v22 = vmul.f32 %v2556_v51, %v1349_v21 }
0x1b4b   :  { %1354 = vrot.lane.b32.xlu0 %v1351_v22, %s2679_s12 }
0x1bbd   :  { %v1355_v25 = vpop.permute.xlu0 %1354 }
0x1bbe   :  { %v1357_v26 = vsel %vm53_vm1, %v1352_v23, %v1355_v25 }
0x1bbf   :  { %2209 = vmatmul.mubr.msk.f32.vlgmr.msra.gmra.mrb[12].mxu0 %vm61_vm2, %v1357_v26 }
0x1bc0   :  { %2438 = vmatpush3.bf16.msra.mxu0 %v2887_v17  ;;  %2246 = vmatprep.mubr.msk.f32.mxu0 %vm2676_vm0, %v2677_v1 }
0x1bc1   :  { %2439 = vmatprep.subr.bf16.mxu0 %v2675_v0 }
0x1bc4   :  { %2441 = vmatpush3.bf16.msra.mxu0 %v2892_v32 }
0x1bc5   :  { %2442 = vmatprep.subr.bf16.mxu0 %v2675_v0 }
0x1bc8   :  { %2444 = vmatpush3.bf16.msra.mxu0 %v2898_v24 }
0x1bc9   :  { %2445 = vmatprep.subr.bf16.mxu0 %v2675_v0 }
0x1bcc   :  { %2447 = vmatpush3.bf16.msra.mxu0 %v2902_v27 }
0x1c92   :  { %v1427_v53 = vpop.f32.mrb[12].mxu0 }
0x1c93   :  { %v1428_v28 = vadd.f32 %v2924_v36, %v1427_v53  ;;  %v2210_v29 = vpop.f32.mrb[13].mxu0 }
0x1c95   :  { %2559 = vtanh.f32 %v1428_v28  ;;  %v1813_v31 = vmul.f32 -1.442695, %v1428_v28 }
0x1c97   :  { %2561 = vpow2.f32 %v1813_v31 }
0x1c9f   :  { %v2560_v30 = vpop.eup %2559 }
0x1ca0   :  { %1440 = vrot.lane.b32.xlu1 %v2560_v30, %s2678_s11 }
0x1ca1   :  { %v2562_v34 = vpop.eup %2561 }
0x1ca2   :  { %v1434_v35 = vadd.f32 1.0, %v2562_v34 }
0x1ca4   :  { %2563 = vrcp.f32 %v1434_v35 }
0x1cae   :  { %v2564_v37 = vpop.eup %2563 }
0x1caf   :  { %v1438_v40 = vmul.f32 %v2564_v37, %v1345_v18 }
0x1d12   :  { %v1441_v38 = vpop.permute.xlu1 %1440 }
0x1d13   :  { %v1443_v39 = vmul.f32 %v2564_v37, %v1441_v38 }
0x1d15   :  { %1445 = vrot.lane.b32.xlu0 %v1443_v39, %s2678_s11 }
0x1d19   :  { %704 = vrot.lane.b32.xlu0 %v2882_v8, %s2680_s13 }
0x1d87   :  { %v1446_v41 = vpop.permute.xlu0 %1445 }
0x1d88   :  { %v1448_v11 = vadd.f32 %v1446_v41, %v1438_v40 }
0x1d8a   :  { %2565 = vtanh.f32 %v1448_v11 }
0x1d8b   :  { %v705_v42 = vpop.permute.xlu0 %704 }
0x1d8c   :  { %708 = vst.msk [vmem:[#allocation2 + $0x28] sm:$0xff] %vm53_vm1, %v705_v42 }
0x1d93   :  { %v1455_v46 = vld [vmem:[#allocation2 + $0x28] sm:$0xff] }
0x1d94   :  { %v2566_v43 = vpop.eup %2565 }
0x1d95   :  { %1451 = vrot.lane.b32.xlu1 %v2566_v43, %s2678_s11 }
0x1e07   :  { %v1452_v44 = vpop.permute.xlu1 %1451 }
0x1e08   :  { %v1454_v45 = vmul.f32 %v2564_v37, %v1452_v44 }
0x1e0a   :  { %1457 = vrot.lane.b32.xlu1 %v1454_v45, %s2679_s12 }
0x1e7c   :  { %v1458_v47 = vpop.permute.xlu1 %1457 }
0x1e7d   :  { %v1460_v48 = vsel %vm53_vm1, %v1455_v46, %v1458_v47 }
0x1e7e   :  { %2228 = vmatmul.mubr.msk.f32.vlgmr.msra.gmra.mrb[12].mxu1 %vm61_vm2, %v1460_v48 }
0x1e7f   :  { %2450 = vmatpush3.bf16.msra.mxu1 %v2887_v17  ;;  %2265 = vmatprep.mubr.msk.f32.mxu1 %vm2676_vm0, %v2677_v1 }
0x1e80   :  { %2451 = vmatprep.subr.bf16.mxu1 %v2675_v0 }
0x1e83   :  { %2453 = vmatpush3.bf16.msra.mxu1 %v2892_v32 }
0x1e84   :  { %2454 = vmatprep.subr.bf16.mxu1 %v2675_v0 }
0x1e87   :  { %2456 = vmatpush3.bf16.msra.mxu1 %v2898_v24  ;;  %v894_v24 = vadd.f32 %v2771_v16, %v2968_v12 }
0x1e88   :  { %2457 = vmatprep.subr.bf16.mxu1 %v2675_v0 }
0x1e89   :  { %v1801_v56 = vmul.f32 -1.442695, %v894_v24 }
0x1e8b   :  { %2459 = vmatpush3.bf16.msra.mxu1 %v2902_v27 }
0x1f51   :  { %v1530_v8 = vpop.f32.mrb[12].mxu1 }
0x1f52   :  { %v1531_v49 = vadd.f32 %v2924_v36, %v1530_v8  ;;  %v2229_v50 = vpop.f32.mrb[13].mxu1 }
0x1f54   :  { %2567 = vtanh.f32 %v1531_v49  ;;  %v1815_v1 = vmul.f32 -1.442695, %v1531_v49 }
0x1f56   :  { %2569 = vpow2.f32 %v1815_v1 }
0x1f5e   :  { %v2568_v17 = vpop.eup %2567 }
0x1f5f   :  { %1543 = vrot.lane.b32.xlu0 %v2568_v17, %s2678_s11 }
0x1f60   :  { %v2570_v52 = vpop.eup %2569 }
0x1f61   :  { %v1537_v32 = vadd.f32 1.0, %v2570_v52 }
0x1f63   :  { %2571 = vrcp.f32 %v1537_v32 }
0x1f64   :  { %2573 = vtanh.f32 %v894_v24 }
0x1f65   :  { %2575 = vpow2.f32 %v1801_v56 }
0x1f6d   :  { %v2572_v54 = vpop.eup %2571 }
0x1f6e   :  { %v2574_v55 = vpop.eup %2573  ;;  %v1541_v59 = vmul.f32 %v2572_v54, %v1448_v11 }
0x1f6f   :  { %v2576_v5 = vpop.eup %2575 }
0x1f70   :  { %v900_v58 = vadd.f32 1.0, %v2576_v5 }
0x1f72   :  { %2577 = vrcp.f32 %v900_v58 }
0x1f7c   :  { %v2578_v7 = vpop.eup %2577 }
0x1f7d   :  { %v904_v62 = vmul.f32 %v2578_v7, %v2931_v57 }
0x1fd1   :  { %v1544_v0 = vpop.permute.xlu0 %1543 }
0x1fd2   :  { %v1546_v27 = vmul.f32 %v2572_v54, %v1544_v0 }
0x1fd4   :  { %1548 = vrot.lane.b32.xlu1 %v1546_v27, %s2678_s11 }
0x1fd8   :  { %813 = vrot.lane.b32.xlu1 %v2938_v10, %s2680_s13 }
0x1fdc   :  { %906 = vrot.lane.b32.xlu1 %v2574_v55, %s2678_s11 }
0x2046   :  { %v1549_v60 = vpop.permute.xlu1 %1548 }
0x2047   :  { %v1551_v16 = vadd.f32 %v1549_v60, %v1541_v59 }
0x2049   :  { %2579 = vtanh.f32 %v1551_v16 }
0x204a   :  { %v814_v12 = vpop.permute.xlu1 %813 }
0x204b   :  { %817 = vst.msk [vmem:[#allocation2 + $0x30] sm:$0xff] %vm53_vm1, %v814_v12 }
0x204e   :  { %v907_v61 = vpop.permute.xlu1 %906 }
0x204f   :  { %v909_v33 = vmul.f32 %v2578_v7, %v907_v61 }
0x2051   :  { %911 = vrot.lane.b32.xlu1 %v909_v33, %s2678_s11 }
0x2052   :  { %v1558_v51 = vld [vmem:[#allocation2 + $0x30] sm:$0xff] }
0x2053   :  { %v2580_v10 = vpop.eup %2579 }
0x2054   :  { %1554 = vrot.lane.b32.xlu0 %v2580_v10, %s2678_s11 }
0x20c3   :  { %v912_v63 = vpop.permute.xlu1 %911 }
0x20c4   :  { %v914_v13 = vadd.f32 %v912_v63, %v904_v62 }
0x20c6   :  { %2581 = vtanh.f32 %v914_v13  ;;  %v1555_v2 = vpop.permute.xlu0 %1554 }
0x20c7   :  { %v1557_v3 = vmul.f32 %v2572_v54, %v1555_v2 }
0x20c9   :  { %1560 = vrot.lane.b32.xlu0 %v1557_v3, %s2679_s12 }
0x20d0   :  { %v2582_v4 = vpop.eup %2581 }
0x20d1   :  { %917 = vrot.lane.b32.xlu1 %v2582_v4, %s2678_s11 }
0x213b   :  { %v1561_v6 = vpop.permute.xlu0 %1560 }
0x213c   :  { %v1563_v9 = vsel %vm53_vm1, %v1558_v51, %v1561_v6 }
0x213d   :  { %2247 = vmatmul.mubr.msk.f32.vlgmr.msra.gmra.mrb[14].mxu0 %vm61_vm2, %v1563_v9 }
0x2143   :  { %v918_v14 = vpop.permute.xlu1 %917 }
0x2144   :  { %v920_v15 = vmul.f32 %v2578_v7, %v918_v14 }
0x2146   :  { %922 = vrot.lane.b32.xlu1 %v920_v15, %s2680_s13 }
0x21b8   :  { %v923_v57 = vpop.permute.xlu1 %922 }
0x21b9   :  { %926 = vst.msk [vmem:[#allocation2 + $0x38] sm:$0xff] %vm53_vm1, %v923_v57 }
0x21c0   :  { %v1661_v38 = vld [vmem:[#allocation2 + $0x38] sm:$0xff] }
0x2210   :  { %v1633_v18 = vpop.f32.mrb[14].mxu0 }
0x2211   :  { %v1634_v19 = vadd.f32 %v2924_v36, %v1633_v18  ;;  %v2248_v20 = vpop.f32.mrb[15].mxu0 }
0x2213   :  { %2583 = vtanh.f32 %v1634_v19  ;;  %v1817_v22 = vmul.f32 -1.442695, %v1634_v19 }
0x2215   :  { %2585 = vpow2.f32 %v1817_v22 }
0x221d   :  { %v2584_v21 = vpop.eup %2583 }
0x221e   :  { %1646 = vrot.lane.b32.xlu0 %v2584_v21, %s2678_s11 }
0x221f   :  { %v2586_v23 = vpop.eup %2585 }
0x2220   :  { %v1640_v25 = vadd.f32 1.0, %v2586_v23 }
0x2222   :  { %2587 = vrcp.f32 %v1640_v25 }
0x222c   :  { %v2588_v26 = vpop.eup %2587 }
0x222d   :  { %v1644_v29 = vmul.f32 %v2588_v26, %v1551_v16 }
0x2290   :  { %v1647_v53 = vpop.permute.xlu0 %1646 }
0x2291   :  { %v1649_v28 = vmul.f32 %v2588_v26, %v1647_v53 }
0x2293   :  { %1651 = vrot.lane.b32.xlu0 %v1649_v28, %s2678_s11 }
0x2305   :  { %v1652_v30 = vpop.permute.xlu0 %1651 }
0x2306   :  { %v1654_v31 = vadd.f32 %v1652_v30, %v1644_v29 }
0x2308   :  { %2589 = vtanh.f32 %v1654_v31 }
0x2312   :  { %v2590_v34 = vpop.eup %2589 }
0x2313   :  { %1657 = vrot.lane.b32.xlu0 %v2590_v34, %s2678_s11 }
0x2385   :  { %v1658_v35 = vpop.permute.xlu0 %1657 }
0x2386   :  { %v1660_v37 = vmul.f32 %v2588_v26, %v1658_v35 }
0x2388   :  { %1663 = vrot.lane.b32.xlu0 %v1660_v37, %s2679_s12 }
0x23fa   :  { %v1664_v39 = vpop.permute.xlu0 %1663 }
0x23fb   :  { %v1666_v40 = vsel %vm53_vm1, %v1661_v38, %v1664_v39 }
0x23fc   :  { %2266 = vmatmul.mubr.msk.f32.vlgmr.msra.gmra.mrb[14].mxu1 %vm61_vm2, %v1666_v40 }
0x24cf   :  { %v1736_v41 = vpop.f32.mrb[14].mxu1 }
0x24d0   :  { %v1737_v11 = vadd.f32 %v2924_v36, %v1736_v41  ;;  %v2267_v42 = vpop.f32.mrb[15].mxu1 }
0x24d2   :  { %2591 = vtanh.f32 %v1737_v11  ;;  %v1819_v44 = vmul.f32 -1.442695, %v1737_v11 }
0x24d4   :  { %2593 = vpow2.f32 %v1819_v44 }
0x24dc   :  { %v2592_v43 = vpop.eup %2591 }
0x24dd   :  { %1749 = vrot.lane.b32.xlu1 %v2592_v43, %s2678_s11 }
0x24de   :  { %v2594_v45 = vpop.eup %2593 }
0x24df   :  { %v1743_v46 = vadd.f32 1.0, %v2594_v45 }
0x24e1   :  { %2595 = vrcp.f32 %v1743_v46 }
0x24eb   :  { %v2596_v47 = vpop.eup %2595 }
0x24ec   :  { %v1747_v49 = vmul.f32 %v2596_v47, %v1654_v31 }
0x254f   :  { %v1750_v48 = vpop.permute.xlu1 %1749 }
0x2550   :  { %v1752_v8 = vmul.f32 %v2596_v47, %v1750_v48 }
0x2552   :  { %1754 = vrot.lane.b32.xlu0 %v1752_v8, %s2678_s11 }
0x25c4   :  { %v1755_v50 = vpop.permute.xlu0 %1754 }
0x25c5   :  { %v1757_v17 = vadd.f32 %v1755_v50, %v1747_v49 }
0x25c7   :  { %2597 = vtanh.f32 %v1757_v17 }
0x25d1   :  { %v2598_v36 = vpop.eup %2597 }
0x25d2   :  { %1760 = vrot.lane.b32.xlu1 %v2598_v36, %s2678_s11 }
0x2644   :  { %v1761_v1 = vpop.permute.xlu1 %1760 }
0x2645   :  { %v1763_v52 = vmul.f32 %v2596_v47, %v1761_v1 }
0x2647   :  { %1765 = vrot.lane.b32.xlu0 %v1763_v52, %s2680_s13 }
0x26b9   :  { %v1766_v32 = vpop.permute.xlu0 %1765 }
0x26ba   :  { %1768 = vst.msk [vmem:[#allocation8] sm:$0xff] %vm53_vm1, %v1766_v32 }
0x26bb   :  { %2654 = shalt.err (!%p2651_p6)
}
0x26bc   :  { %s2655_s20 = scalar_lea.hbm %s3094_s3, 128 }
0x26bd   :  { %p2656_p7 = scmp.ne.s32.totalorder %s3094_s3, %s2655_s20  ;;  %p2659_p8 = scmp.lt.u32.totalorder %s2655_s20, %s3094_s3 }
0x26bf   :  { %p2661_p9 = pnand %p2659_p8, %p2656_p7 }
0x26c1   :  { %2664 = shalt.err (!%p2661_p9)
}
0x26c2   :  { %1778 = dma.vmem_to_hbm [thread:$0]  %s1776_s16, 128, %s3094_s3, [#allocation5]  }
0x26c3   :  { %2669 = dma.done.wait [#allocation5], 128  }
0x26c4   :  { %2670 = vsyncadd [#allocation5], 4294967168 }
0x26c5   :  { %1782 = vsyncpa [#allocation4], 1 }
0x26c6   :  { %1783 = vsyncpa [#allocation7], 1 }
0x26c7   :  { %1784 = vsyncpa [#allocation5], 1 }

</bundles_post_ra>
